<compile_context>
chip_gen: v5e
topology: v5e:2x2
jax: 0.10.0
libtpu: 0.0.40
codegen_flags: <defaults>
</compile_context>

<pallas_src>
import functools
from collections import OrderedDict

import jax
import jax.numpy as jnp
from jax import lax
from jax.experimental import pallas as pl
from jax.experimental.pallas import tpu as pltpu

LANE = 128


def _round_up(x, m):
    return ((x + m - 1) // m) * m


# ----------------------------------------------------------------------------- kernel ---
def _extra_chain_kernel(*refs, dims):
    """One batch element per grid step: run the whole `extra` chain keeping every
    intermediate in VMEM / vregs (never re-touching HBM between blocks).

    refs layout: [x] + 6 params per block (w1,b1,dw,b2,w3,b3) + per-block out refs
                 + per-block padded-intermediate VMEM scratch refs.
    dims: tuple per block of (H, W, H_out, W_out) static spatial sizes.
    """
    n_blocks = len(dims)
    x_ref = refs[0]
    w_refs = refs[1:1 + 6 * n_blocks]
    out_refs = refs[1 + 6 * n_blocks:1 + 7 * n_blocks]
    pad_refs = refs[1 + 7 * n_blocks:1 + 8 * n_blocks]

    y = x_ref[0]                                            # (H, W, Cin) f32
    for b in range(n_blocks):
        w1, b1, dw, b2, w3, b3 = w_refs[6 * b:6 * b + 6]
        pad = pad_refs[b]
        h, w, h2, w2 = dims[b]
        c_in = y.shape[-1]
        c_mid = w1.shape[-1]
        c_out = w3.shape[-1]

        # ---- 1x1 conv (c_in -> c_mid) + folded-BN shift + ReLU6 :: bf16 MXU, f32 acc
        t = jnp.dot(y.reshape(h * w, c_in).astype(jnp.bfloat16), w1[...],
                    preferred_element_type=jnp.float32)
        t = jnp.clip(t + b1[...], 0.0, 6.0).reshape(h, w, c_mid)

        # ---- depthwise 3x3, stride 2, pad 1 (+ BN shift + ReLU6); halo built in VMEM
        pad[...] = jnp.zeros_like(pad)                      # zero halo (and spare rows)
        pad[1:h + 1, 1:w + 1, :] = t                        # interior
        dwv = dw[...]                                       # (3, 3, c_mid) f32
        acc = jnp.zeros((h2, w2, c_mid), jnp.float32)
        for dj in range(3):
            # stride-2 column subsample straight from the VMEM scratch (strided load)
            cols = pad[:, pl.ds(dj, w2, stride=2), :]       # (h + 3, w2, c_mid)
            for di in range(3):
                rows = cols[di:di + 2 * h2]                 # contiguous rows
                tap = rows.reshape(h2, 2, w2, c_mid)[:, 0]  # stride-2 rows via major split
                acc = acc + tap * dwv[di, dj, :]
        t2 = jnp.clip(acc + b2[...], 0.0, 6.0)

        # ---- 1x1 conv (c_mid -> c_out) + folded-BN shift + ReLU6 :: bf16 MXU, f32 acc
        t3 = jnp.dot(t2.reshape(h2 * w2, c_mid).astype(jnp.bfloat16), w3[...],
                     preferred_element_type=jnp.float32)
        t3 = jnp.clip(t3 + b3[...], 0.0, 6.0)

        out_refs[b][...] = t3.reshape(1, h2, w2, c_out)     # lane-dense (c_out % 128 == 0)
        y = t3.reshape(h2, w2, c_out)                       # feed next block (stays in VMEM)


def _extra_chain(x_nhwc, params):
    """Run all `extra` blocks in one fused pallas_call. Returns a tuple of NHWC outputs
    with lane-padded channel dims."""
    n, h, w, _ = x_nhwc.shape

    dims = []
    inputs = [x_nhwc]
    in_specs = [pl.BlockSpec((1, h, w, x_nhwc.shape[-1]), lambda i: (i, 0, 0, 0))]
    out_shapes = []
    out_specs = []
    scratch = []
    for p in params:
        c_mid_p = p["w1"].shape[1]
        c_out_p = p["w3"].shape[1]
        h2, w2 = (h + 1) // 2, (w + 1) // 2
        dims.append((h, w, h2, w2))
        inputs += [p["w1"], p["b1"], p["dw"], p["b2"], p["w3"], p["b3"]]
        in_specs += [
            pl.BlockSpec(p["w1"].shape, lambda i: (0, 0)),
            pl.BlockSpec(p["b1"].shape, lambda i: (0, 0)),
            pl.BlockSpec(p["dw"].shape, lambda i: (0, 0, 0)),
            pl.BlockSpec(p["b2"].shape, lambda i: (0, 0)),
            pl.BlockSpec(p["w3"].shape, lambda i: (0, 0)),
            pl.BlockSpec(p["b3"].shape, lambda i: (0, 0)),
        ]
        out_shapes.append(jax.ShapeDtypeStruct((n, h2, w2, c_out_p), jnp.float32))
        out_specs.append(pl.BlockSpec((1, h2, w2, c_out_p), lambda i: (i, 0, 0, 0)))
        # (h+3, w+2): pad=1 halo plus one spare zero row for the stride-2 row trick
        scratch.append(pltpu.VMEM((h + 3, w + 2, c_mid_p), jnp.float32))
        h, w = h2, w2

    kernel = functools.partial(_extra_chain_kernel, dims=tuple(dims))
    return pl.pallas_call(
        kernel,
        grid=(n,),
        in_specs=in_specs,
        out_specs=tuple(out_specs),
        out_shape=tuple(out_shapes),
        scratch_shapes=tuple(scratch),
        compiler_params=pltpu.CompilerParams(
            # batch steps are independent -> shard across TensorCores (v7x megacore)
            dimension_semantics=("parallel",),
            # explicit scoped-VMEM bound, safe on v7x's 64 MiB physical VMEM
            vmem_limit_bytes=32 * 1024 * 1024,
        ),
    )(*inputs)


# ----------------------------------------------------------------------- module wrapper ---
def ssdlite_feature_extractor_forward(x_nchw, extra_params, feature_blocks=()):
    """SSDLiteFeatureExtractorMobileNet.forward: collect the output of every sub-block."""
    output = []
    x = x_nchw
    # TODO(synk): the MobileNetV3 backbone wrapped by `self.features` is external to this
    # spec; its two stages must be supplied by the caller as NCHW->NCHW callables.
    for block in feature_blocks:
        x = block(x)
        output.append(x)

    # `self.extra`: one fused Pallas call for the whole chain (NHWC, channel-padded inside)
    x_nhwc = jnp.transpose(x, (0, 2, 3, 1))
    extra_outs = _extra_chain(x_nhwc, extra_params)
    for p, o in zip(extra_params, extra_outs):
        output.append(jnp.transpose(o[..., :p["c_out"]], (0, 3, 1, 2)))  # back to NCHW
    return OrderedDict((str(i), v) for i, v in enumerate(output))


# -------------------------------------------------------------------------- parameters ---
def init_extra_block_params(key, c_in, c_out, *, in_rows=None, eps=1e-3):
    """One torchvision `_extra_block`: conv weights ~ N(0, 0.03) (_normal_init), no conv
    bias (BN present), BatchNorm2d(eps) folded for inference with default parameters /
    running stats (gamma=1, beta=0, mean=0, var=1).

    Emits kernel-side tensors (BN scale folded into weights, channels zero-padded to a
    lane multiple, matmul weights pre-cast to bf16) plus unpadded f32 reference copies."""
    mid = c_out // 2
    if in_rows is None:
        in_rows = c_in
    mid_p = _round_up(mid, LANE)
    out_p = _round_up(c_out, LANE)

    k1, k2, k3 = jax.random.split(key, 3)
    w1 = 0.03 * jax.random.normal(k1, (c_in, mid), jnp.float32)   # torch (mid, c_in, 1, 1).T
    dw = 0.03 * jax.random.normal(k2, (3, 3, mid), jnp.float32)   # torch (mid, 1, 3, 3) perm
    w3 = 0.03 * jax.random.normal(k3, (mid, c_out), jnp.float32)

    # inference BN fold: scale = gamma / sqrt(var + eps), shift = beta - mean * scale
    bn_scale = 1.0 / jnp.sqrt(1.0 + eps)
    w1_f, dw_f, w3_f = w1 * bn_scale, dw * bn_scale, w3 * bn_scale
    s1_f = jnp.zeros((mid,), jnp.float32)
    s2_f = jnp.zeros((mid,), jnp.float32)
    s3_f = jnp.zeros((c_out,), jnp.float32)

    w1_pad = jnp.zeros((in_rows, mid_p), jnp.float32).at[:c_in, :mid].set(w1_f)
    w3_pad = jnp.zeros((mid_p, out_p), jnp.float32).at[:mid, :c_out].set(w3_f)
    dw_pad = jnp.zeros((3, 3, mid_p), jnp.float32).at[:, :, :mid].set(dw_f)
    b1_pad = jnp.zeros((1, mid_p), jnp.float32).at[0, :mid].set(s1_f)
    b2_pad = jnp.zeros((1, mid_p), jnp.float32).at[0, :mid].set(s2_f)
    b3_pad = jnp.zeros((1, out_p), jnp.float32).at[0, :c_out].set(s3_f)

    return dict(
        c_in=c_in, c_mid=mid, c_out=c_out,
        w1=w1_pad.astype(jnp.bfloat16), b1=b1_pad,
        dw=dw_pad, b2=b2_pad,
        w3=w3_pad.astype(jnp.bfloat16), b3=b3_pad,
        w1_f=w1_f, s1_f=s1_f, dw_f=dw_f, s2_f=s2_f, w3_f=w3_f, s3_f=s3_f,
    )


# -------------------------------------------------------------------- pure-JAX reference ---
def _reference_extra_block(x_nhwc, p):
    hp = lax.Precision.HIGHEST
    y = jnp.einsum("nhwc,cd->nhwd", x_nhwc, p["w1_f"], precision=hp) + p["s1_f"]
    y = jnp.clip(y, 0.0, 6.0)
    dwk = p["dw_f"].reshape(3, 3, 1, p["c_mid"])
    y = lax.conv_general_dilated(
        y, dwk, window_strides=(2, 2), padding=((1, 1), (1, 1)),
        dimension_numbers=("NHWC", "HWIO", "NHWC"),
        feature_group_count=p["c_mid"], precision=hp) + p["s2_f"]
    y = jnp.clip(y, 0.0, 6.0)
    y = jnp.einsum("nhwc,cd->nhwd", y, p["w3_f"], precision=hp) + p["s3_f"]
    return jnp.clip(y, 0.0, 6.0)


def _reference_extra_chain(x_nhwc, params):
    outs = []
    y = x_nhwc
    for p in params:
        y = _reference_extra_block(y, p)
        outs.append(y)
    return outs


# --------------------------------------------------------------------------------- main ---
if __name__ == "__main__":
    key = jax.random.PRNGKey(0)

    batch = 2
    c5_channels = 64          # small stand-in for backbone[-1].out_channels
    spatial = 8               # C5 feature-map size
    # small-width version of the real 512 / 256 / 256 / 128 extra chain (mid = out // 2)
    chain = [(c5_channels, 64), (64, 32), (32, 32), (32, 16)]

    params = []
    in_rows = c5_channels     # first block consumes the unpadded input channels
    for c_in, c_out in chain:
        key, sub = jax.random.split(key)
        params.append(init_extra_block_params(sub, c_in, c_out, in_rows=in_rows))
        in_rows = _round_up(c_out, LANE)   # later blocks consume lane-padded outputs

    key, sub = jax.random.split(key)
    x = jax.random.normal(sub, (batch, c5_channels, spatial, spatial), jnp.float32)

    out = ssdlite_feature_extractor_forward(x, params)
    out = jax.tree_util.tree_map(jax.block_until_ready, out)

    # shape check (stride-2 chain: 8 -> 4 -> 2 -> 1 -> 1)
    h = spatial
    for i, (_, c_out) in enumerate(chain):
        h = (h + 1) // 2
        assert out[str(i)].shape == (batch, c_out, h, h), out[str(i)].shape

    # numerical check vs. a pure-JAX/XLA reference of the same extra chain
    ref = _reference_extra_chain(jnp.transpose(x, (0, 2, 3, 1)), params)
    for i, r in enumerate(ref):
        got = jnp.transpose(out[str(i)], (0, 2, 3, 1))
        err = float(jnp.max(jnp.abs(got - r)))
        scale = float(jnp.max(jnp.abs(r))) + 1e-9
        assert err <= 2e-2 * scale + 1e-6, (i, err, scale)

    print("KERNEL_OK")
</pallas_src>

<mosaic_0001>
module attributes {stable_mosaic.version = 11 : i64} {
  func.func @_extra_chain_kernel(%arg0: i32, %arg1: memref<1x8x8x64xf32, #tpu.memory_space<vmem>>, %arg2: memref<64x128xbf16, #tpu.memory_space<vmem>>, %arg3: memref<1x128xf32, #tpu.memory_space<vmem>>, %arg4: memref<3x3x128xf32, #tpu.memory_space<vmem>>, %arg5: memref<1x128xf32, #tpu.memory_space<vmem>>, %arg6: memref<128x128xbf16, #tpu.memory_space<vmem>>, %arg7: memref<1x128xf32, #tpu.memory_space<vmem>>, %arg8: memref<128x128xbf16, #tpu.memory_space<vmem>>, %arg9: memref<1x128xf32, #tpu.memory_space<vmem>>, %arg10: memref<3x3x128xf32, #tpu.memory_space<vmem>>, %arg11: memref<1x128xf32, #tpu.memory_space<vmem>>, %arg12: memref<128x128xbf16, #tpu.memory_space<vmem>>, %arg13: memref<1x128xf32, #tpu.memory_space<vmem>>, %arg14: memref<128x128xbf16, #tpu.memory_space<vmem>>, %arg15: memref<1x128xf32, #tpu.memory_space<vmem>>, %arg16: memref<3x3x128xf32, #tpu.memory_space<vmem>>, %arg17: memref<1x128xf32, #tpu.memory_space<vmem>>, %arg18: memref<128x128xbf16, #tpu.memory_space<vmem>>, %arg19: memref<1x128xf32, #tpu.memory_space<vmem>>, %arg20: memref<128x128xbf16, #tpu.memory_space<vmem>>, %arg21: memref<1x128xf32, #tpu.memory_space<vmem>>, %arg22: memref<3x3x128xf32, #tpu.memory_space<vmem>>, %arg23: memref<1x128xf32, #tpu.memory_space<vmem>>, %arg24: memref<128x128xbf16, #tpu.memory_space<vmem>>, %arg25: memref<1x128xf32, #tpu.memory_space<vmem>>, %arg26: memref<1x4x4x128xf32, #tpu.memory_space<vmem>>, %arg27: memref<1x2x2x128xf32, #tpu.memory_space<vmem>>, %arg28: memref<1x1x1x128xf32, #tpu.memory_space<vmem>>, %arg29: memref<1x1x1x128xf32, #tpu.memory_space<vmem>>, %arg30: memref<11x10x128xf32, #tpu.memory_space<vmem>>, %arg31: memref<7x6x128xf32, #tpu.memory_space<vmem>>, %arg32: memref<5x4x128xf32, #tpu.memory_space<vmem>>, %arg33: memref<4x3x128xf32, #tpu.memory_space<vmem>>) attributes {dimension_semantics = [#tpu.dimension_semantics<parallel>], iteration_bounds = array<i64: 2>, scalar_prefetch = 0 : i64, scratch_operands = 4 : i64, tpu.core_type = #tpu.core_type<tc>, window_params = [{transform_indices = @transform_0, window_bounds = array<i64: 1, 8, 8, 64>}, {pipeline_mode = #tpu.pipeline_mode<synchronous>, transform_indices = @transform_1, window_bounds = array<i64: 64, 128>}, {pipeline_mode = #tpu.pipeline_mode<synchronous>, transform_indices = @transform_2, window_bounds = array<i64: 1, 128>}, {pipeline_mode = #tpu.pipeline_mode<synchronous>, transform_indices = @transform_3, window_bounds = array<i64: 3, 3, 128>}, {pipeline_mode = #tpu.pipeline_mode<synchronous>, transform_indices = @transform_4, window_bounds = array<i64: 1, 128>}, {pipeline_mode = #tpu.pipeline_mode<synchronous>, transform_indices = @transform_5, window_bounds = array<i64: 128, 128>}, {pipeline_mode = #tpu.pipeline_mode<synchronous>, transform_indices = @transform_6, window_bounds = array<i64: 1, 128>}, {pipeline_mode = #tpu.pipeline_mode<synchronous>, transform_indices = @transform_7, window_bounds = array<i64: 128, 128>}, {pipeline_mode = #tpu.pipeline_mode<synchronous>, transform_indices = @transform_8, window_bounds = array<i64: 1, 128>}, {pipeline_mode = #tpu.pipeline_mode<synchronous>, transform_indices = @transform_9, window_bounds = array<i64: 3, 3, 128>}, {pipeline_mode = #tpu.pipeline_mode<synchronous>, transform_indices = @transform_10, window_bounds = array<i64: 1, 128>}, {pipeline_mode = #tpu.pipeline_mode<synchronous>, transform_indices = @transform_11, window_bounds = array<i64: 128, 128>}, {pipeline_mode = #tpu.pipeline_mode<synchronous>, transform_indices = @transform_12, window_bounds = array<i64: 1, 128>}, {pipeline_mode = #tpu.pipeline_mode<synchronous>, transform_indices = @transform_13, window_bounds = array<i64: 128, 128>}, {pipeline_mode = #tpu.pipeline_mode<synchronous>, transform_indices = @transform_14, window_bounds = array<i64: 1, 128>}, {pipeline_mode = #tpu.pipeline_mode<synchronous>, transform_indices = @transform_15, window_bounds = array<i64: 3, 3, 128>}, {pipeline_mode = #tpu.pipeline_mode<synchronous>, transform_indices = @transform_16, window_bounds = array<i64: 1, 128>}, {pipeline_mode = #tpu.pipeline_mode<synchronous>, transform_indices = @transform_17, window_bounds = array<i64: 128, 128>}, {pipeline_mode = #tpu.pipeline_mode<synchronous>, transform_indices = @transform_18, window_bounds = array<i64: 1, 128>}, {pipeline_mode = #tpu.pipeline_mode<synchronous>, transform_indices = @transform_19, window_bounds = array<i64: 128, 128>}, {pipeline_mode = #tpu.pipeline_mode<synchronous>, transform_indices = @transform_20, window_bounds = array<i64: 1, 128>}, {pipeline_mode = #tpu.pipeline_mode<synchronous>, transform_indices = @transform_21, window_bounds = array<i64: 3, 3, 128>}, {pipeline_mode = #tpu.pipeline_mode<synchronous>, transform_indices = @transform_22, window_bounds = array<i64: 1, 128>}, {pipeline_mode = #tpu.pipeline_mode<synchronous>, transform_indices = @transform_23, window_bounds = array<i64: 128, 128>}, {pipeline_mode = #tpu.pipeline_mode<synchronous>, transform_indices = @transform_24, window_bounds = array<i64: 1, 128>}, {transform_indices = @transform_25, window_bounds = array<i64: 1, 4, 4, 128>}, {transform_indices = @transform_26, window_bounds = array<i64: 1, 2, 2, 128>}, {transform_indices = @transform_27, window_bounds = array<i64: 1, 1, 1, 128>}, {transform_indices = @transform_28, window_bounds = array<i64: 1, 1, 1, 128>}]} {
    %c0 = arith.constant 0 : index
    %c0_0 = arith.constant 0 : index
    %c0_1 = arith.constant 0 : index
    %c0_2 = arith.constant 0 : index
    %0 = vector.load %arg1[%c0, %c0_0, %c0_1, %c0_2] : memref<1x8x8x64xf32, #tpu.memory_space<vmem>>, vector<1x8x8x64xf32>
    %1 = vector.shape_cast %0 : vector<1x8x8x64xf32> to vector<8x8x64xf32>
    %2 = vector.shape_cast %1 : vector<8x8x64xf32> to vector<64x64xf32>
    %3 = arith.truncf %2 : vector<64x64xf32> to vector<64x64xbf16>
    %c0_3 = arith.constant 0 : index
    %c0_4 = arith.constant 0 : index
    %4 = vector.load %arg2[%c0_3, %c0_4] : memref<64x128xbf16, #tpu.memory_space<vmem>>, vector<64x128xbf16>
    %cst = arith.constant dense<0.000000e+00> : vector<64x128xf32>
    %5 = tpu.matmul %3, %4, %cst {dimension_numbers = #tpu.dot_dimension_numbers<[1], [0], [0], [1], [0, 0, 1, 1], [], []>} : vector<64x64xbf16>, vector<64x128xbf16>, vector<64x128xf32> -> vector<64x128xf32>
    %c0_5 = arith.constant 0 : index
    %c0_6 = arith.constant 0 : index
    %6 = vector.load %arg3[%c0_5, %c0_6] : memref<1x128xf32, #tpu.memory_space<vmem>>, vector<1x128xf32>
    %7 = vector.broadcast %6 : vector<1x128xf32> to vector<64x128xf32>
    %8 = arith.addf %5, %7 : vector<64x128xf32>
    %cst_7 = arith.constant 0.000000e+00 : f32
    %cst_8 = arith.constant 6.000000e+00 : f32
    %9 = vector.broadcast %cst_7 : f32 to vector<64x128xf32>
    %10 = arith.maximumf %9, %8 : vector<64x128xf32>
    %11 = vector.broadcast %cst_8 : f32 to vector<64x128xf32>
    %12 = arith.minimumf %11, %10 : vector<64x128xf32>
    %13 = vector.shape_cast %12 : vector<64x128xf32> to vector<8x8x128xf32>
    %cst_9 = arith.constant 0.000000e+00 : f32
    %14 = vector.broadcast %cst_9 : f32 to vector<11x10x128xf32>
    %c0_10 = arith.constant 0 : index
    %c0_11 = arith.constant 0 : index
    %c0_12 = arith.constant 0 : index
    %15 = vector.load %arg30[%c0_10, %c0_11, %c0_12] : memref<11x10x128xf32, #tpu.memory_space<vmem>>, vector<11x10x128xf32>
    tpu.vector_store %arg30[%c0_10, %c0_11, %c0_12], %14 {strides = array<i32>} : memref<11x10x128xf32, #tpu.memory_space<vmem>>, vector<11x10x128xf32>,
    %c1 = arith.constant 1 : index
    %c1_13 = arith.constant 1 : index
    %c0_14 = arith.constant 0 : index
    %16 = vector.load %arg30[%c1, %c1_13, %c0_14] : memref<11x10x128xf32, #tpu.memory_space<vmem>>, vector<8x8x128xf32>
    tpu.vector_store %arg30[%c1, %c1_13, %c0_14], %13 {strides = array<i32>} : memref<11x10x128xf32, #tpu.memory_space<vmem>>, vector<8x8x128xf32>,
    %c0_15 = arith.constant 0 : index
    %c0_16 = arith.constant 0 : index
    %c0_17 = arith.constant 0 : index
    %17 = vector.load %arg4[%c0_15, %c0_16, %c0_17] : memref<3x3x128xf32, #tpu.memory_space<vmem>>, vector<3x3x128xf32>
    %cst_18 = arith.constant 0.000000e+00 : f32
    %18 = vector.broadcast %cst_18 : f32 to vector<4x4x128xf32>
    %c0_19 = arith.constant 0 : index
    %c0_20 = arith.constant 0 : index
    %c0_21 = arith.constant 0 : index
    %19 = tpu.strided_load %arg30[%c0_19, %c0_20, %c0_21] {strides = array<i32: 1, 2, 1>} : memref<11x10x128xf32, #tpu.memory_space<vmem>>, vector<11x4x128xf32>
    %20 = vector.extract_strided_slice %19 {offsets = [0, 0, 0], sizes = [8, 4, 128], strides = [1, 1, 1]} : vector<11x4x128xf32> to vector<8x4x128xf32>
    %21 = vector.shape_cast %20 : vector<8x4x128xf32> to vector<4x2x4x128xf32>
    %22 = vector.extract_strided_slice %21 {offsets = [0, 0, 0, 0], sizes = [4, 1, 4, 128], strides = [1, 1, 1, 1]} : vector<4x2x4x128xf32> to vector<4x1x4x128xf32>
    %23 = vector.shape_cast %22 : vector<4x1x4x128xf32> to vector<4x4x128xf32>
    %24 = vector.extract_strided_slice %17 {offsets = [0, 0, 0], sizes = [1, 1, 128], strides = [1, 1, 1]} : vector<3x3x128xf32> to vector<1x1x128xf32>
    %25 = vector.shape_cast %24 : vector<1x1x128xf32> to vector<128xf32>
    %26 = vector.shape_cast %25 : vector<128xf32> to vector<1x1x128xf32>
    %27 = vector.broadcast %26 : vector<1x1x128xf32> to vector<4x4x128xf32>
    %28 = arith.mulf %23, %27 : vector<4x4x128xf32>
    %29 = arith.addf %18, %28 : vector<4x4x128xf32>
    %30 = vector.extract_strided_slice %19 {offsets = [1, 0, 0], sizes = [8, 4, 128], strides = [1, 1, 1]} : vector<11x4x128xf32> to vector<8x4x128xf32>
    %31 = vector.shape_cast %30 : vector<8x4x128xf32> to vector<4x2x4x128xf32>
    %32 = vector.extract_strided_slice %31 {offsets = [0, 0, 0, 0], sizes = [4, 1, 4, 128], strides = [1, 1, 1, 1]} : vector<4x2x4x128xf32> to vector<4x1x4x128xf32>
    %33 = vector.shape_cast %32 : vector<4x1x4x128xf32> to vector<4x4x128xf32>
    %34 = vector.extract_strided_slice %17 {offsets = [1, 0, 0], sizes = [1, 1, 128], strides = [1, 1, 1]} : vector<3x3x128xf32> to vector<1x1x128xf32>
    %35 = vector.shape_cast %34 : vector<1x1x128xf32> to vector<128xf32>
    %36 = vector.shape_cast %35 : vector<128xf32> to vector<1x1x128xf32>
    %37 = vector.broadcast %36 : vector<1x1x128xf32> to vector<4x4x128xf32>
    %38 = arith.mulf %33, %37 : vector<4x4x128xf32>
    %39 = arith.addf %29, %38 : vector<4x4x128xf32>
    %40 = vector.extract_strided_slice %19 {offsets = [2, 0, 0], sizes = [8, 4, 128], strides = [1, 1, 1]} : vector<11x4x128xf32> to vector<8x4x128xf32>
    %41 = vector.shape_cast %40 : vector<8x4x128xf32> to vector<4x2x4x128xf32>
    %42 = vector.extract_strided_slice %41 {offsets = [0, 0, 0, 0], sizes = [4, 1, 4, 128], strides = [1, 1, 1, 1]} : vector<4x2x4x128xf32> to vector<4x1x4x128xf32>
    %43 = vector.shape_cast %42 : vector<4x1x4x128xf32> to vector<4x4x128xf32>
    %44 = vector.extract_strided_slice %17 {offsets = [2, 0, 0], sizes = [1, 1, 128], strides = [1, 1, 1]} : vector<3x3x128xf32> to vector<1x1x128xf32>
    %45 = vector.shape_cast %44 : vector<1x1x128xf32> to vector<128xf32>
    %46 = vector.shape_cast %45 : vector<128xf32> to vector<1x1x128xf32>
    %47 = vector.broadcast %46 : vector<1x1x128xf32> to vector<4x4x128xf32>
    %48 = arith.mulf %43, %47 : vector<4x4x128xf32>
    %49 = arith.addf %39, %48 : vector<4x4x128xf32>
    %c0_22 = arith.constant 0 : index
    %c1_23 = arith.constant 1 : index
    %c0_24 = arith.constant 0 : index
    %50 = tpu.strided_load %arg30[%c0_22, %c1_23, %c0_24] {strides = array<i32: 1, 2, 1>} : memref<11x10x128xf32, #tpu.memory_space<vmem>>, vector<11x4x128xf32>
    %51 = vector.extract_strided_slice %50 {offsets = [0, 0, 0], sizes = [8, 4, 128], strides = [1, 1, 1]} : vector<11x4x128xf32> to vector<8x4x128xf32>
    %52 = vector.shape_cast %51 : vector<8x4x128xf32> to vector<4x2x4x128xf32>
    %53 = vector.extract_strided_slice %52 {offsets = [0, 0, 0, 0], sizes = [4, 1, 4, 128], strides = [1, 1, 1, 1]} : vector<4x2x4x128xf32> to vector<4x1x4x128xf32>
    %54 = vector.shape_cast %53 : vector<4x1x4x128xf32> to vector<4x4x128xf32>
    %55 = vector.extract_strided_slice %17 {offsets = [0, 1, 0], sizes = [1, 1, 128], strides = [1, 1, 1]} : vector<3x3x128xf32> to vector<1x1x128xf32>
    %56 = vector.shape_cast %55 : vector<1x1x128xf32> to vector<128xf32>
    %57 = vector.shape_cast %56 : vector<128xf32> to vector<1x1x128xf32>
    %58 = vector.broadcast %57 : vector<1x1x128xf32> to vector<4x4x128xf32>
    %59 = arith.mulf %54, %58 : vector<4x4x128xf32>
    %60 = arith.addf %49, %59 : vector<4x4x128xf32>
    %61 = vector.extract_strided_slice %50 {offsets = [1, 0, 0], sizes = [8, 4, 128], strides = [1, 1, 1]} : vector<11x4x128xf32> to vector<8x4x128xf32>
    %62 = vector.shape_cast %61 : vector<8x4x128xf32> to vector<4x2x4x128xf32>
    %63 = vector.extract_strided_slice %62 {offsets = [0, 0, 0, 0], sizes = [4, 1, 4, 128], strides = [1, 1, 1, 1]} : vector<4x2x4x128xf32> to vector<4x1x4x128xf32>
    %64 = vector.shape_cast %63 : vector<4x1x4x128xf32> to vector<4x4x128xf32>
    %65 = vector.extract_strided_slice %17 {offsets = [1, 1, 0], sizes = [1, 1, 128], strides = [1, 1, 1]} : vector<3x3x128xf32> to vector<1x1x128xf32>
    %66 = vector.shape_cast %65 : vector<1x1x128xf32> to vector<128xf32>
    %67 = vector.shape_cast %66 : vector<128xf32> to vector<1x1x128xf32>
    %68 = vector.broadcast %67 : vector<1x1x128xf32> to vector<4x4x128xf32>
    %69 = arith.mulf %64, %68 : vector<4x4x128xf32>
    %70 = arith.addf %60, %69 : vector<4x4x128xf32>
    %71 = vector.extract_strided_slice %50 {offsets = [2, 0, 0], sizes = [8, 4, 128], strides = [1, 1, 1]} : vector<11x4x128xf32> to vector<8x4x128xf32>
    %72 = vector.shape_cast %71 : vector<8x4x128xf32> to vector<4x2x4x128xf32>
    %73 = vector.extract_strided_slice %72 {offsets = [0, 0, 0, 0], sizes = [4, 1, 4, 128], strides = [1, 1, 1, 1]} : vector<4x2x4x128xf32> to vector<4x1x4x128xf32>
    %74 = vector.shape_cast %73 : vector<4x1x4x128xf32> to vector<4x4x128xf32>
    %75 = vector.extract_strided_slice %17 {offsets = [2, 1, 0], sizes = [1, 1, 128], strides = [1, 1, 1]} : vector<3x3x128xf32> to vector<1x1x128xf32>
    %76 = vector.shape_cast %75 : vector<1x1x128xf32> to vector<128xf32>
    %77 = vector.shape_cast %76 : vector<128xf32> to vector<1x1x128xf32>
    %78 = vector.broadcast %77 : vector<1x1x128xf32> to vector<4x4x128xf32>
    %79 = arith.mulf %74, %78 : vector<4x4x128xf32>
    %80 = arith.addf %70, %79 : vector<4x4x128xf32>
    %c0_25 = arith.constant 0 : index
    %c2 = arith.constant 2 : index
    %c0_26 = arith.constant 0 : index
    %81 = tpu.strided_load %arg30[%c0_25, %c2, %c0_26] {strides = array<i32: 1, 2, 1>} : memref<11x10x128xf32, #tpu.memory_space<vmem>>, vector<11x4x128xf32>
    %82 = vector.extract_strided_slice %81 {offsets = [0, 0, 0], sizes = [8, 4, 128], strides = [1, 1, 1]} : vector<11x4x128xf32> to vector<8x4x128xf32>
    %83 = vector.shape_cast %82 : vector<8x4x128xf32> to vector<4x2x4x128xf32>
    %84 = vector.extract_strided_slice %83 {offsets = [0, 0, 0, 0], sizes = [4, 1, 4, 128], strides = [1, 1, 1, 1]} : vector<4x2x4x128xf32> to vector<4x1x4x128xf32>
    %85 = vector.shape_cast %84 : vector<4x1x4x128xf32> to vector<4x4x128xf32>
    %86 = vector.extract_strided_slice %17 {offsets = [0, 2, 0], sizes = [1, 1, 128], strides = [1, 1, 1]} : vector<3x3x128xf32> to vector<1x1x128xf32>
    %87 = vector.shape_cast %86 : vector<1x1x128xf32> to vector<128xf32>
    %88 = vector.shape_cast %87 : vector<128xf32> to vector<1x1x128xf32>
    %89 = vector.broadcast %88 : vector<1x1x128xf32> to vector<4x4x128xf32>
    %90 = arith.mulf %85, %89 : vector<4x4x128xf32>
    %91 = arith.addf %80, %90 : vector<4x4x128xf32>
    %92 = vector.extract_strided_slice %81 {offsets = [1, 0, 0], sizes = [8, 4, 128], strides = [1, 1, 1]} : vector<11x4x128xf32> to vector<8x4x128xf32>
    %93 = vector.shape_cast %92 : vector<8x4x128xf32> to vector<4x2x4x128xf32>
    %94 = vector.extract_strided_slice %93 {offsets = [0, 0, 0, 0], sizes = [4, 1, 4, 128], strides = [1, 1, 1, 1]} : vector<4x2x4x128xf32> to vector<4x1x4x128xf32>
    %95 = vector.shape_cast %94 : vector<4x1x4x128xf32> to vector<4x4x128xf32>
    %96 = vector.extract_strided_slice %17 {offsets = [1, 2, 0], sizes = [1, 1, 128], strides = [1, 1, 1]} : vector<3x3x128xf32> to vector<1x1x128xf32>
    %97 = vector.shape_cast %96 : vector<1x1x128xf32> to vector<128xf32>
    %98 = vector.shape_cast %97 : vector<128xf32> to vector<1x1x128xf32>
    %99 = vector.broadcast %98 : vector<1x1x128xf32> to vector<4x4x128xf32>
    %100 = arith.mulf %95, %99 : vector<4x4x128xf32>
    %101 = arith.addf %91, %100 : vector<4x4x128xf32>
    %102 = vector.extract_strided_slice %81 {offsets = [2, 0, 0], sizes = [8, 4, 128], strides = [1, 1, 1]} : vector<11x4x128xf32> to vector<8x4x128xf32>
    %103 = vector.shape_cast %102 : vector<8x4x128xf32> to vector<4x2x4x128xf32>
    %104 = vector.extract_strided_slice %103 {offsets = [0, 0, 0, 0], sizes = [4, 1, 4, 128], strides = [1, 1, 1, 1]} : vector<4x2x4x128xf32> to vector<4x1x4x128xf32>
    %105 = vector.shape_cast %104 : vector<4x1x4x128xf32> to vector<4x4x128xf32>
    %106 = vector.extract_strided_slice %17 {offsets = [2, 2, 0], sizes = [1, 1, 128], strides = [1, 1, 1]} : vector<3x3x128xf32> to vector<1x1x128xf32>
    %107 = vector.shape_cast %106 : vector<1x1x128xf32> to vector<128xf32>
    %108 = vector.shape_cast %107 : vector<128xf32> to vector<1x1x128xf32>
    %109 = vector.broadcast %108 : vector<1x1x128xf32> to vector<4x4x128xf32>
    %110 = arith.mulf %105, %109 : vector<4x4x128xf32>
    %111 = arith.addf %101, %110 : vector<4x4x128xf32>
    %c0_27 = arith.constant 0 : index
    %c0_28 = arith.constant 0 : index
    %112 = vector.load %arg5[%c0_27, %c0_28] : memref<1x128xf32, #tpu.memory_space<vmem>>, vector<1x128xf32>
    %113 = vector.shape_cast %112 : vector<1x128xf32> to vector<1x1x128xf32>
    %114 = vector.broadcast %113 : vector<1x1x128xf32> to vector<4x4x128xf32>
    %115 = arith.addf %111, %114 : vector<4x4x128xf32>
    %cst_29 = arith.constant 0.000000e+00 : f32
    %cst_30 = arith.constant 6.000000e+00 : f32
    %116 = vector.broadcast %cst_29 : f32 to vector<4x4x128xf32>
    %117 = arith.maximumf %116, %115 : vector<4x4x128xf32>
    %118 = vector.broadcast %cst_30 : f32 to vector<4x4x128xf32>
    %119 = arith.minimumf %118, %117 : vector<4x4x128xf32>
    %120 = vector.shape_cast %119 : vector<4x4x128xf32> to vector<16x128xf32>
    %121 = arith.truncf %120 : vector<16x128xf32> to vector<16x128xbf16>
    %c0_31 = arith.constant 0 : index
    %c0_32 = arith.constant 0 : index
    %122 = vector.load %arg6[%c0_31, %c0_32] : memref<128x128xbf16, #tpu.memory_space<vmem>>, vector<128x128xbf16>
    %cst_33 = arith.constant dense<0.000000e+00> : vector<16x128xf32>
    %123 = tpu.matmul %121, %122, %cst_33 {dimension_numbers = #tpu.dot_dimension_numbers<[1], [0], [0], [1], [0, 0, 1, 1], [], []>} : vector<16x128xbf16>, vector<128x128xbf16>, vector<16x128xf32> -> vector<16x128xf32>
    %c0_34 = arith.constant 0 : index
    %c0_35 = arith.constant 0 : index
    %124 = vector.load %arg7[%c0_34, %c0_35] : memref<1x128xf32, #tpu.memory_space<vmem>>, vector<1x128xf32>
    %125 = vector.broadcast %124 : vector<1x128xf32> to vector<16x128xf32>
    %126 = arith.addf %123, %125 : vector<16x128xf32>
    %cst_36 = arith.constant 0.000000e+00 : f32
    %cst_37 = arith.constant 6.000000e+00 : f32
    %127 = vector.broadcast %cst_36 : f32 to vector<16x128xf32>
    %128 = arith.maximumf %127, %126 : vector<16x128xf32>
    %129 = vector.broadcast %cst_37 : f32 to vector<16x128xf32>
    %130 = arith.minimumf %129, %128 : vector<16x128xf32>
    %131 = vector.shape_cast %130 : vector<16x128xf32> to vector<1x4x4x128xf32>
    %c0_38 = arith.constant 0 : index
    %c0_39 = arith.constant 0 : index
    %c0_40 = arith.constant 0 : index
    %c0_41 = arith.constant 0 : index
    %132 = vector.load %arg26[%c0_38, %c0_39, %c0_40, %c0_41] : memref<1x4x4x128xf32, #tpu.memory_space<vmem>>, vector<1x4x4x128xf32>
    tpu.vector_store %arg26[%c0_38, %c0_39, %c0_40, %c0_41], %131 {strides = array<i32>} : memref<1x4x4x128xf32, #tpu.memory_space<vmem>>, vector<1x4x4x128xf32>,
    %133 = vector.shape_cast %130 : vector<16x128xf32> to vector<4x4x128xf32>
    %134 = vector.shape_cast %133 : vector<4x4x128xf32> to vector<16x128xf32>
    %135 = arith.truncf %134 : vector<16x128xf32> to vector<16x128xbf16>
    %c0_42 = arith.constant 0 : index
    %c0_43 = arith.constant 0 : index
    %136 = vector.load %arg8[%c0_42, %c0_43] : memref<128x128xbf16, #tpu.memory_space<vmem>>, vector<128x128xbf16>
    %cst_44 = arith.constant dense<0.000000e+00> : vector<16x128xf32>
    %137 = tpu.matmul %135, %136, %cst_44 {dimension_numbers = #tpu.dot_dimension_numbers<[1], [0], [0], [1], [0, 0, 1, 1], [], []>} : vector<16x128xbf16>, vector<128x128xbf16>, vector<16x128xf32> -> vector<16x128xf32>
    %c0_45 = arith.constant 0 : index
    %c0_46 = arith.constant 0 : index
    %138 = vector.load %arg9[%c0_45, %c0_46] : memref<1x128xf32, #tpu.memory_space<vmem>>, vector<1x128xf32>
    %139 = vector.broadcast %138 : vector<1x128xf32> to vector<16x128xf32>
    %140 = arith.addf %137, %139 : vector<16x128xf32>
    %cst_47 = arith.constant 0.000000e+00 : f32
    %cst_48 = arith.constant 6.000000e+00 : f32
    %141 = vector.broadcast %cst_47 : f32 to vector<16x128xf32>
    %142 = arith.maximumf %141, %140 : vector<16x128xf32>
    %143 = vector.broadcast %cst_48 : f32 to vector<16x128xf32>
    %144 = arith.minimumf %143, %142 : vector<16x128xf32>
    %145 = vector.shape_cast %144 : vector<16x128xf32> to vector<4x4x128xf32>
    %cst_49 = arith.constant 0.000000e+00 : f32
    %146 = vector.broadcast %cst_49 : f32 to vector<7x6x128xf32>
    %c0_50 = arith.constant 0 : index
    %c0_51 = arith.constant 0 : index
    %c0_52 = arith.constant 0 : index
    %147 = vector.load %arg31[%c0_50, %c0_51, %c0_52] : memref<7x6x128xf32, #tpu.memory_space<vmem>>, vector<7x6x128xf32>
    tpu.vector_store %arg31[%c0_50, %c0_51, %c0_52], %146 {strides = array<i32>} : memref<7x6x128xf32, #tpu.memory_space<vmem>>, vector<7x6x128xf32>,
    %c1_53 = arith.constant 1 : index
    %c1_54 = arith.constant 1 : index
    %c0_55 = arith.constant 0 : index
    %148 = vector.load %arg31[%c1_53, %c1_54, %c0_55] : memref<7x6x128xf32, #tpu.memory_space<vmem>>, vector<4x4x128xf32>
    tpu.vector_store %arg31[%c1_53, %c1_54, %c0_55], %145 {strides = array<i32>} : memref<7x6x128xf32, #tpu.memory_space<vmem>>, vector<4x4x128xf32>,
    %c0_56 = arith.constant 0 : index
    %c0_57 = arith.constant 0 : index
    %c0_58 = arith.constant 0 : index
    %149 = vector.load %arg10[%c0_56, %c0_57, %c0_58] : memref<3x3x128xf32, #tpu.memory_space<vmem>>, vector<3x3x128xf32>
    %cst_59 = arith.constant 0.000000e+00 : f32
    %150 = vector.broadcast %cst_59 : f32 to vector<2x2x128xf32>
    %c0_60 = arith.constant 0 : index
    %c0_61 = arith.constant 0 : index
    %c0_62 = arith.constant 0 : index
    %151 = tpu.strided_load %arg31[%c0_60, %c0_61, %c0_62] {strides = array<i32: 1, 2, 1>} : memref<7x6x128xf32, #tpu.memory_space<vmem>>, vector<7x2x128xf32>
    %152 = vector.extract_strided_slice %151 {offsets = [0, 0, 0], sizes = [4, 2, 128], strides = [1, 1, 1]} : vector<7x2x128xf32> to vector<4x2x128xf32>
    %153 = vector.shape_cast %152 : vector<4x2x128xf32> to vector<2x2x2x128xf32>
    %154 = vector.extract_strided_slice %153 {offsets = [0, 0, 0, 0], sizes = [2, 1, 2, 128], strides = [1, 1, 1, 1]} : vector<2x2x2x128xf32> to vector<2x1x2x128xf32>
    %155 = vector.shape_cast %154 : vector<2x1x2x128xf32> to vector<2x2x128xf32>
    %156 = vector.extract_strided_slice %149 {offsets = [0, 0, 0], sizes = [1, 1, 128], strides = [1, 1, 1]} : vector<3x3x128xf32> to vector<1x1x128xf32>
    %157 = vector.shape_cast %156 : vector<1x1x128xf32> to vector<128xf32>
    %158 = vector.shape_cast %157 : vector<128xf32> to vector<1x1x128xf32>
    %159 = vector.broadcast %158 : vector<1x1x128xf32> to vector<2x2x128xf32>
    %160 = arith.mulf %155, %159 : vector<2x2x128xf32>
    %161 = arith.addf %150, %160 : vector<2x2x128xf32>
    %162 = vector.extract_strided_slice %151 {offsets = [1, 0, 0], sizes = [4, 2, 128], strides = [1, 1, 1]} : vector<7x2x128xf32> to vector<4x2x128xf32>
    %163 = vector.shape_cast %162 : vector<4x2x128xf32> to vector<2x2x2x128xf32>
    %164 = vector.extract_strided_slice %163 {offsets = [0, 0, 0, 0], sizes = [2, 1, 2, 128], strides = [1, 1, 1, 1]} : vector<2x2x2x128xf32> to vector<2x1x2x128xf32>
    %165 = vector.shape_cast %164 : vector<2x1x2x128xf32> to vector<2x2x128xf32>
    %166 = vector.extract_strided_slice %149 {offsets = [1, 0, 0], sizes = [1, 1, 128], strides = [1, 1, 1]} : vector<3x3x128xf32> to vector<1x1x128xf32>
    %167 = vector.shape_cast %166 : vector<1x1x128xf32> to vector<128xf32>
    %168 = vector.shape_cast %167 : vector<128xf32> to vector<1x1x128xf32>
    %169 = vector.broadcast %168 : vector<1x1x128xf32> to vector<2x2x128xf32>
    %170 = arith.mulf %165, %169 : vector<2x2x128xf32>
    %171 = arith.addf %161, %170 : vector<2x2x128xf32>
    %172 = vector.extract_strided_slice %151 {offsets = [2, 0, 0], sizes = [4, 2, 128], strides = [1, 1, 1]} : vector<7x2x128xf32> to vector<4x2x128xf32>
    %173 = vector.shape_cast %172 : vector<4x2x128xf32> to vector<2x2x2x128xf32>
    %174 = vector.extract_strided_slice %173 {offsets = [0, 0, 0, 0], sizes = [2, 1, 2, 128], strides = [1, 1, 1, 1]} : vector<2x2x2x128xf32> to vector<2x1x2x128xf32>
    %175 = vector.shape_cast %174 : vector<2x1x2x128xf32> to vector<2x2x128xf32>
    %176 = vector.extract_strided_slice %149 {offsets = [2, 0, 0], sizes = [1, 1, 128], strides = [1, 1, 1]} : vector<3x3x128xf32> to vector<1x1x128xf32>
    %177 = vector.shape_cast %176 : vector<1x1x128xf32> to vector<128xf32>
    %178 = vector.shape_cast %177 : vector<128xf32> to vector<1x1x128xf32>
    %179 = vector.broadcast %178 : vector<1x1x128xf32> to vector<2x2x128xf32>
    %180 = arith.mulf %175, %179 : vector<2x2x128xf32>
    %181 = arith.addf %171, %180 : vector<2x2x128xf32>
    %c0_63 = arith.constant 0 : index
    %c1_64 = arith.constant 1 : index
    %c0_65 = arith.constant 0 : index
    %182 = tpu.strided_load %arg31[%c0_63, %c1_64, %c0_65] {strides = array<i32: 1, 2, 1>} : memref<7x6x128xf32, #tpu.memory_space<vmem>>, vector<7x2x128xf32>
    %183 = vector.extract_strided_slice %182 {offsets = [0, 0, 0], sizes = [4, 2, 128], strides = [1, 1, 1]} : vector<7x2x128xf32> to vector<4x2x128xf32>
    %184 = vector.shape_cast %183 : vector<4x2x128xf32> to vector<2x2x2x128xf32>
    %185 = vector.extract_strided_slice %184 {offsets = [0, 0, 0, 0], sizes = [2, 1, 2, 128], strides = [1, 1, 1, 1]} : vector<2x2x2x128xf32> to vector<2x1x2x128xf32>
    %186 = vector.shape_cast %185 : vector<2x1x2x128xf32> to vector<2x2x128xf32>
    %187 = vector.extract_strided_slice %149 {offsets = [0, 1, 0], sizes = [1, 1, 128], strides = [1, 1, 1]} : vector<3x3x128xf32> to vector<1x1x128xf32>
    %188 = vector.shape_cast %187 : vector<1x1x128xf32> to vector<128xf32>
    %189 = vector.shape_cast %188 : vector<128xf32> to vector<1x1x128xf32>
    %190 = vector.broadcast %189 : vector<1x1x128xf32> to vector<2x2x128xf32>
    %191 = arith.mulf %186, %190 : vector<2x2x128xf32>
    %192 = arith.addf %181, %191 : vector<2x2x128xf32>
    %193 = vector.extract_strided_slice %182 {offsets = [1, 0, 0], sizes = [4, 2, 128], strides = [1, 1, 1]} : vector<7x2x128xf32> to vector<4x2x128xf32>
    %194 = vector.shape_cast %193 : vector<4x2x128xf32> to vector<2x2x2x128xf32>
    %195 = vector.extract_strided_slice %194 {offsets = [0, 0, 0, 0], sizes = [2, 1, 2, 128], strides = [1, 1, 1, 1]} : vector<2x2x2x128xf32> to vector<2x1x2x128xf32>
    %196 = vector.shape_cast %195 : vector<2x1x2x128xf32> to vector<2x2x128xf32>
    %197 = vector.extract_strided_slice %149 {offsets = [1, 1, 0], sizes = [1, 1, 128], strides = [1, 1, 1]} : vector<3x3x128xf32> to vector<1x1x128xf32>
    %198 = vector.shape_cast %197 : vector<1x1x128xf32> to vector<128xf32>
    %199 = vector.shape_cast %198 : vector<128xf32> to vector<1x1x128xf32>
    %200 = vector.broadcast %199 : vector<1x1x128xf32> to vector<2x2x128xf32>
    %201 = arith.mulf %196, %200 : vector<2x2x128xf32>
    %202 = arith.addf %192, %201 : vector<2x2x128xf32>
    %203 = vector.extract_strided_slice %182 {offsets = [2, 0, 0], sizes = [4, 2, 128], strides = [1, 1, 1]} : vector<7x2x128xf32> to vector<4x2x128xf32>
    %204 = vector.shape_cast %203 : vector<4x2x128xf32> to vector<2x2x2x128xf32>
    %205 = vector.extract_strided_slice %204 {offsets = [0, 0, 0, 0], sizes = [2, 1, 2, 128], strides = [1, 1, 1, 1]} : vector<2x2x2x128xf32> to vector<2x1x2x128xf32>
    %206 = vector.shape_cast %205 : vector<2x1x2x128xf32> to vector<2x2x128xf32>
    %207 = vector.extract_strided_slice %149 {offsets = [2, 1, 0], sizes = [1, 1, 128], strides = [1, 1, 1]} : vector<3x3x128xf32> to vector<1x1x128xf32>
    %208 = vector.shape_cast %207 : vector<1x1x128xf32> to vector<128xf32>
    %209 = vector.shape_cast %208 : vector<128xf32> to vector<1x1x128xf32>
    %210 = vector.broadcast %209 : vector<1x1x128xf32> to vector<2x2x128xf32>
    %211 = arith.mulf %206, %210 : vector<2x2x128xf32>
    %212 = arith.addf %202, %211 : vector<2x2x128xf32>
    %c0_66 = arith.constant 0 : index
    %c2_67 = arith.constant 2 : index
    %c0_68 = arith.constant 0 : index
    %213 = tpu.strided_load %arg31[%c0_66, %c2_67, %c0_68] {strides = array<i32: 1, 2, 1>} : memref<7x6x128xf32, #tpu.memory_space<vmem>>, vector<7x2x128xf32>
    %214 = vector.extract_strided_slice %213 {offsets = [0, 0, 0], sizes = [4, 2, 128], strides = [1, 1, 1]} : vector<7x2x128xf32> to vector<4x2x128xf32>
    %215 = vector.shape_cast %214 : vector<4x2x128xf32> to vector<2x2x2x128xf32>
    %216 = vector.extract_strided_slice %215 {offsets = [0, 0, 0, 0], sizes = [2, 1, 2, 128], strides = [1, 1, 1, 1]} : vector<2x2x2x128xf32> to vector<2x1x2x128xf32>
    %217 = vector.shape_cast %216 : vector<2x1x2x128xf32> to vector<2x2x128xf32>
    %218 = vector.extract_strided_slice %149 {offsets = [0, 2, 0], sizes = [1, 1, 128], strides = [1, 1, 1]} : vector<3x3x128xf32> to vector<1x1x128xf32>
    %219 = vector.shape_cast %218 : vector<1x1x128xf32> to vector<128xf32>
    %220 = vector.shape_cast %219 : vector<128xf32> to vector<1x1x128xf32>
    %221 = vector.broadcast %220 : vector<1x1x128xf32> to vector<2x2x128xf32>
    %222 = arith.mulf %217, %221 : vector<2x2x128xf32>
    %223 = arith.addf %212, %222 : vector<2x2x128xf32>
    %224 = vector.extract_strided_slice %213 {offsets = [1, 0, 0], sizes = [4, 2, 128], strides = [1, 1, 1]} : vector<7x2x128xf32> to vector<4x2x128xf32>
    %225 = vector.shape_cast %224 : vector<4x2x128xf32> to vector<2x2x2x128xf32>
    %226 = vector.extract_strided_slice %225 {offsets = [0, 0, 0, 0], sizes = [2, 1, 2, 128], strides = [1, 1, 1, 1]} : vector<2x2x2x128xf32> to vector<2x1x2x128xf32>
    %227 = vector.shape_cast %226 : vector<2x1x2x128xf32> to vector<2x2x128xf32>
    %228 = vector.extract_strided_slice %149 {offsets = [1, 2, 0], sizes = [1, 1, 128], strides = [1, 1, 1]} : vector<3x3x128xf32> to vector<1x1x128xf32>
    %229 = vector.shape_cast %228 : vector<1x1x128xf32> to vector<128xf32>
    %230 = vector.shape_cast %229 : vector<128xf32> to vector<1x1x128xf32>
    %231 = vector.broadcast %230 : vector<1x1x128xf32> to vector<2x2x128xf32>
    %232 = arith.mulf %227, %231 : vector<2x2x128xf32>
    %233 = arith.addf %223, %232 : vector<2x2x128xf32>
    %234 = vector.extract_strided_slice %213 {offsets = [2, 0, 0], sizes = [4, 2, 128], strides = [1, 1, 1]} : vector<7x2x128xf32> to vector<4x2x128xf32>
    %235 = vector.shape_cast %234 : vector<4x2x128xf32> to vector<2x2x2x128xf32>
    %236 = vector.extract_strided_slice %235 {offsets = [0, 0, 0, 0], sizes = [2, 1, 2, 128], strides = [1, 1, 1, 1]} : vector<2x2x2x128xf32> to vector<2x1x2x128xf32>
    %237 = vector.shape_cast %236 : vector<2x1x2x128xf32> to vector<2x2x128xf32>
    %238 = vector.extract_strided_slice %149 {offsets = [2, 2, 0], sizes = [1, 1, 128], strides = [1, 1, 1]} : vector<3x3x128xf32> to vector<1x1x128xf32>
    %239 = vector.shape_cast %238 : vector<1x1x128xf32> to vector<128xf32>
    %240 = vector.shape_cast %239 : vector<128xf32> to vector<1x1x128xf32>
    %241 = vector.broadcast %240 : vector<1x1x128xf32> to vector<2x2x128xf32>
    %242 = arith.mulf %237, %241 : vector<2x2x128xf32>
    %243 = arith.addf %233, %242 : vector<2x2x128xf32>
    %c0_69 = arith.constant 0 : index
    %c0_70 = arith.constant 0 : index
    %244 = vector.load %arg11[%c0_69, %c0_70] : memref<1x128xf32, #tpu.memory_space<vmem>>, vector<1x128xf32>
    %245 = vector.shape_cast %244 : vector<1x128xf32> to vector<1x1x128xf32>
    %246 = vector.broadcast %245 : vector<1x1x128xf32> to vector<2x2x128xf32>
    %247 = arith.addf %243, %246 : vector<2x2x128xf32>
    %cst_71 = arith.constant 0.000000e+00 : f32
    %cst_72 = arith.constant 6.000000e+00 : f32
    %248 = vector.broadcast %cst_71 : f32 to vector<2x2x128xf32>
    %249 = arith.maximumf %248, %247 : vector<2x2x128xf32>
    %250 = vector.broadcast %cst_72 : f32 to vector<2x2x128xf32>
    %251 = arith.minimumf %250, %249 : vector<2x2x128xf32>
    %252 = vector.shape_cast %251 : vector<2x2x128xf32> to vector<4x128xf32>
    %253 = arith.truncf %252 : vector<4x128xf32> to vector<4x128xbf16>
    %c0_73 = arith.constant 0 : index
    %c0_74 = arith.constant 0 : index
    %254 = vector.load %arg12[%c0_73, %c0_74] : memref<128x128xbf16, #tpu.memory_space<vmem>>, vector<128x128xbf16>
    %cst_75 = arith.constant dense<0.000000e+00> : vector<4x128xf32>
    %255 = tpu.matmul %253, %254, %cst_75 {dimension_numbers = #tpu.dot_dimension_numbers<[1], [0], [0], [1], [0, 0, 1, 1], [], []>} : vector<4x128xbf16>, vector<128x128xbf16>, vector<4x128xf32> -> vector<4x128xf32>
    %c0_76 = arith.constant 0 : index
    %c0_77 = arith.constant 0 : index
    %256 = vector.load %arg13[%c0_76, %c0_77] : memref<1x128xf32, #tpu.memory_space<vmem>>, vector<1x128xf32>
    %257 = vector.broadcast %256 : vector<1x128xf32> to vector<4x128xf32>
    %258 = arith.addf %255, %257 : vector<4x128xf32>
    %cst_78 = arith.constant 0.000000e+00 : f32
    %cst_79 = arith.constant 6.000000e+00 : f32
    %259 = vector.broadcast %cst_78 : f32 to vector<4x128xf32>
    %260 = arith.maximumf %259, %258 : vector<4x128xf32>
    %261 = vector.broadcast %cst_79 : f32 to vector<4x128xf32>
    %262 = arith.minimumf %261, %260 : vector<4x128xf32>
    %263 = vector.shape_cast %262 : vector<4x128xf32> to vector<1x2x2x128xf32>
    %c0_80 = arith.constant 0 : index
    %c0_81 = arith.constant 0 : index
    %c0_82 = arith.constant 0 : index
    %c0_83 = arith.constant 0 : index
    %264 = vector.load %arg27[%c0_80, %c0_81, %c0_82, %c0_83] : memref<1x2x2x128xf32, #tpu.memory_space<vmem>>, vector<1x2x2x128xf32>
    tpu.vector_store %arg27[%c0_80, %c0_81, %c0_82, %c0_83], %263 {strides = array<i32>} : memref<1x2x2x128xf32, #tpu.memory_space<vmem>>, vector<1x2x2x128xf32>,
    %265 = vector.shape_cast %262 : vector<4x128xf32> to vector<2x2x128xf32>
    %266 = vector.shape_cast %265 : vector<2x2x128xf32> to vector<4x128xf32>
    %267 = arith.truncf %266 : vector<4x128xf32> to vector<4x128xbf16>
    %c0_84 = arith.constant 0 : index
    %c0_85 = arith.constant 0 : index
    %268 = vector.load %arg14[%c0_84, %c0_85] : memref<128x128xbf16, #tpu.memory_space<vmem>>, vector<128x128xbf16>
    %cst_86 = arith.constant dense<0.000000e+00> : vector<4x128xf32>
    %269 = tpu.matmul %267, %268, %cst_86 {dimension_numbers = #tpu.dot_dimension_numbers<[1], [0], [0], [1], [0, 0, 1, 1], [], []>} : vector<4x128xbf16>, vector<128x128xbf16>, vector<4x128xf32> -> vector<4x128xf32>
    %c0_87 = arith.constant 0 : index
    %c0_88 = arith.constant 0 : index
    %270 = vector.load %arg15[%c0_87, %c0_88] : memref<1x128xf32, #tpu.memory_space<vmem>>, vector<1x128xf32>
    %271 = vector.broadcast %270 : vector<1x128xf32> to vector<4x128xf32>
    %272 = arith.addf %269, %271 : vector<4x128xf32>
    %cst_89 = arith.constant 0.000000e+00 : f32
    %cst_90 = arith.constant 6.000000e+00 : f32
    %273 = vector.broadcast %cst_89 : f32 to vector<4x128xf32>
    %274 = arith.maximumf %273, %272 : vector<4x128xf32>
    %275 = vector.broadcast %cst_90 : f32 to vector<4x128xf32>
    %276 = arith.minimumf %275, %274 : vector<4x128xf32>
    %277 = vector.shape_cast %276 : vector<4x128xf32> to vector<2x2x128xf32>
    %cst_91 = arith.constant 0.000000e+00 : f32
    %278 = vector.broadcast %cst_91 : f32 to vector<5x4x128xf32>
    %c0_92 = arith.constant 0 : index
    %c0_93 = arith.constant 0 : index
    %c0_94 = arith.constant 0 : index
    %279 = vector.load %arg32[%c0_92, %c0_93, %c0_94] : memref<5x4x128xf32, #tpu.memory_space<vmem>>, vector<5x4x128xf32>
    tpu.vector_store %arg32[%c0_92, %c0_93, %c0_94], %278 {strides = array<i32>} : memref<5x4x128xf32, #tpu.memory_space<vmem>>, vector<5x4x128xf32>,
    %c1_95 = arith.constant 1 : index
    %c1_96 = arith.constant 1 : index
    %c0_97 = arith.constant 0 : index
    %280 = vector.load %arg32[%c1_95, %c1_96, %c0_97] : memref<5x4x128xf32, #tpu.memory_space<vmem>>, vector<2x2x128xf32>
    tpu.vector_store %arg32[%c1_95, %c1_96, %c0_97], %277 {strides = array<i32>} : memref<5x4x128xf32, #tpu.memory_space<vmem>>, vector<2x2x128xf32>,
    %c0_98 = arith.constant 0 : index
    %c0_99 = arith.constant 0 : index
    %c0_100 = arith.constant 0 : index
    %281 = vector.load %arg16[%c0_98, %c0_99, %c0_100] : memref<3x3x128xf32, #tpu.memory_space<vmem>>, vector<3x3x128xf32>
    %cst_101 = arith.constant 0.000000e+00 : f32
    %282 = vector.broadcast %cst_101 : f32 to vector<1x1x128xf32>
    %c0_102 = arith.constant 0 : index
    %c0_103 = arith.constant 0 : index
    %c0_104 = arith.constant 0 : index
    %283 = tpu.strided_load %arg32[%c0_102, %c0_103, %c0_104] {strides = array<i32: 1, 2, 1>} : memref<5x4x128xf32, #tpu.memory_space<vmem>>, vector<5x1x128xf32>
    %284 = vector.extract_strided_slice %283 {offsets = [0, 0, 0], sizes = [2, 1, 128], strides = [1, 1, 1]} : vector<5x1x128xf32> to vector<2x1x128xf32>
    %285 = vector.shape_cast %284 : vector<2x1x128xf32> to vector<1x2x1x128xf32>
    %286 = vector.extract_strided_slice %285 {offsets = [0, 0, 0, 0], sizes = [1, 1, 1, 128], strides = [1, 1, 1, 1]} : vector<1x2x1x128xf32> to vector<1x1x1x128xf32>
    %287 = vector.shape_cast %286 : vector<1x1x1x128xf32> to vector<1x1x128xf32>
    %288 = vector.extract_strided_slice %281 {offsets = [0, 0, 0], sizes = [1, 1, 128], strides = [1, 1, 1]} : vector<3x3x128xf32> to vector<1x1x128xf32>
    %289 = vector.shape_cast %288 : vector<1x1x128xf32> to vector<128xf32>
    %290 = vector.shape_cast %289 : vector<128xf32> to vector<1x1x128xf32>
    %291 = arith.mulf %287, %290 : vector<1x1x128xf32>
    %292 = arith.addf %282, %291 : vector<1x1x128xf32>
    %293 = vector.extract_strided_slice %283 {offsets = [1, 0, 0], sizes = [2, 1, 128], strides = [1, 1, 1]} : vector<5x1x128xf32> to vector<2x1x128xf32>
    %294 = vector.shape_cast %293 : vector<2x1x128xf32> to vector<1x2x1x128xf32>
    %295 = vector.extract_strided_slice %294 {offsets = [0, 0, 0, 0], sizes = [1, 1, 1, 128], strides = [1, 1, 1, 1]} : vector<1x2x1x128xf32> to vector<1x1x1x128xf32>
    %296 = vector.shape_cast %295 : vector<1x1x1x128xf32> to vector<1x1x128xf32>
    %297 = vector.extract_strided_slice %281 {offsets = [1, 0, 0], sizes = [1, 1, 128], strides = [1, 1, 1]} : vector<3x3x128xf32> to vector<1x1x128xf32>
    %298 = vector.shape_cast %297 : vector<1x1x128xf32> to vector<128xf32>
    %299 = vector.shape_cast %298 : vector<128xf32> to vector<1x1x128xf32>
    %300 = arith.mulf %296, %299 : vector<1x1x128xf32>
    %301 = arith.addf %292, %300 : vector<1x1x128xf32>
    %302 = vector.extract_strided_slice %283 {offsets = [2, 0, 0], sizes = [2, 1, 128], strides = [1, 1, 1]} : vector<5x1x128xf32> to vector<2x1x128xf32>
    %303 = vector.shape_cast %302 : vector<2x1x128xf32> to vector<1x2x1x128xf32>
    %304 = vector.extract_strided_slice %303 {offsets = [0, 0, 0, 0], sizes = [1, 1, 1, 128], strides = [1, 1, 1, 1]} : vector<1x2x1x128xf32> to vector<1x1x1x128xf32>
    %305 = vector.shape_cast %304 : vector<1x1x1x128xf32> to vector<1x1x128xf32>
    %306 = vector.extract_strided_slice %281 {offsets = [2, 0, 0], sizes = [1, 1, 128], strides = [1, 1, 1]} : vector<3x3x128xf32> to vector<1x1x128xf32>
    %307 = vector.shape_cast %306 : vector<1x1x128xf32> to vector<128xf32>
    %308 = vector.shape_cast %307 : vector<128xf32> to vector<1x1x128xf32>
    %309 = arith.mulf %305, %308 : vector<1x1x128xf32>
    %310 = arith.addf %301, %309 : vector<1x1x128xf32>
    %c0_105 = arith.constant 0 : index
    %c1_106 = arith.constant 1 : index
    %c0_107 = arith.constant 0 : index
    %311 = tpu.strided_load %arg32[%c0_105, %c1_106, %c0_107] {strides = array<i32: 1, 2, 1>} : memref<5x4x128xf32, #tpu.memory_space<vmem>>, vector<5x1x128xf32>
    %312 = vector.extract_strided_slice %311 {offsets = [0, 0, 0], sizes = [2, 1, 128], strides = [1, 1, 1]} : vector<5x1x128xf32> to vector<2x1x128xf32>
    %313 = vector.shape_cast %312 : vector<2x1x128xf32> to vector<1x2x1x128xf32>
    %314 = vector.extract_strided_slice %313 {offsets = [0, 0, 0, 0], sizes = [1, 1, 1, 128], strides = [1, 1, 1, 1]} : vector<1x2x1x128xf32> to vector<1x1x1x128xf32>
    %315 = vector.shape_cast %314 : vector<1x1x1x128xf32> to vector<1x1x128xf32>
    %316 = vector.extract_strided_slice %281 {offsets = [0, 1, 0], sizes = [1, 1, 128], strides = [1, 1, 1]} : vector<3x3x128xf32> to vector<1x1x128xf32>
    %317 = vector.shape_cast %316 : vector<1x1x128xf32> to vector<128xf32>
    %318 = vector.shape_cast %317 : vector<128xf32> to vector<1x1x128xf32>
    %319 = arith.mulf %315, %318 : vector<1x1x128xf32>
    %320 = arith.addf %310, %319 : vector<1x1x128xf32>
    %321 = vector.extract_strided_slice %311 {offsets = [1, 0, 0], sizes = [2, 1, 128], strides = [1, 1, 1]} : vector<5x1x128xf32> to vector<2x1x128xf32>
    %322 = vector.shape_cast %321 : vector<2x1x128xf32> to vector<1x2x1x128xf32>
    %323 = vector.extract_strided_slice %322 {offsets = [0, 0, 0, 0], sizes = [1, 1, 1, 128], strides = [1, 1, 1, 1]} : vector<1x2x1x128xf32> to vector<1x1x1x128xf32>
    %324 = vector.shape_cast %323 : vector<1x1x1x128xf32> to vector<1x1x128xf32>
    %325 = vector.extract_strided_slice %281 {offsets = [1, 1, 0], sizes = [1, 1, 128], strides = [1, 1, 1]} : vector<3x3x128xf32> to vector<1x1x128xf32>
    %326 = vector.shape_cast %325 : vector<1x1x128xf32> to vector<128xf32>
    %327 = vector.shape_cast %326 : vector<128xf32> to vector<1x1x128xf32>
    %328 = arith.mulf %324, %327 : vector<1x1x128xf32>
    %329 = arith.addf %320, %328 : vector<1x1x128xf32>
    %330 = vector.extract_strided_slice %311 {offsets = [2, 0, 0], sizes = [2, 1, 128], strides = [1, 1, 1]} : vector<5x1x128xf32> to vector<2x1x128xf32>
    %331 = vector.shape_cast %330 : vector<2x1x128xf32> to vector<1x2x1x128xf32>
    %332 = vector.extract_strided_slice %331 {offsets = [0, 0, 0, 0], sizes = [1, 1, 1, 128], strides = [1, 1, 1, 1]} : vector<1x2x1x128xf32> to vector<1x1x1x128xf32>
    %333 = vector.shape_cast %332 : vector<1x1x1x128xf32> to vector<1x1x128xf32>
    %334 = vector.extract_strided_slice %281 {offsets = [2, 1, 0], sizes = [1, 1, 128], strides = [1, 1, 1]} : vector<3x3x128xf32> to vector<1x1x128xf32>
    %335 = vector.shape_cast %334 : vector<1x1x128xf32> to vector<128xf32>
    %336 = vector.shape_cast %335 : vector<128xf32> to vector<1x1x128xf32>
    %337 = arith.mulf %333, %336 : vector<1x1x128xf32>
    %338 = arith.addf %329, %337 : vector<1x1x128xf32>
    %c0_108 = arith.constant 0 : index
    %c2_109 = arith.constant 2 : index
    %c0_110 = arith.constant 0 : index
    %339 = tpu.strided_load %arg32[%c0_108, %c2_109, %c0_110] {strides = array<i32: 1, 2, 1>} : memref<5x4x128xf32, #tpu.memory_space<vmem>>, vector<5x1x128xf32>
    %340 = vector.extract_strided_slice %339 {offsets = [0, 0, 0], sizes = [2, 1, 128], strides = [1, 1, 1]} : vector<5x1x128xf32> to vector<2x1x128xf32>
    %341 = vector.shape_cast %340 : vector<2x1x128xf32> to vector<1x2x1x128xf32>
    %342 = vector.extract_strided_slice %341 {offsets = [0, 0, 0, 0], sizes = [1, 1, 1, 128], strides = [1, 1, 1, 1]} : vector<1x2x1x128xf32> to vector<1x1x1x128xf32>
    %343 = vector.shape_cast %342 : vector<1x1x1x128xf32> to vector<1x1x128xf32>
    %344 = vector.extract_strided_slice %281 {offsets = [0, 2, 0], sizes = [1, 1, 128], strides = [1, 1, 1]} : vector<3x3x128xf32> to vector<1x1x128xf32>
    %345 = vector.shape_cast %344 : vector<1x1x128xf32> to vector<128xf32>
    %346 = vector.shape_cast %345 : vector<128xf32> to vector<1x1x128xf32>
    %347 = arith.mulf %343, %346 : vector<1x1x128xf32>
    %348 = arith.addf %338, %347 : vector<1x1x128xf32>
    %349 = vector.extract_strided_slice %339 {offsets = [1, 0, 0], sizes = [2, 1, 128], strides = [1, 1, 1]} : vector<5x1x128xf32> to vector<2x1x128xf32>
    %350 = vector.shape_cast %349 : vector<2x1x128xf32> to vector<1x2x1x128xf32>
    %351 = vector.extract_strided_slice %350 {offsets = [0, 0, 0, 0], sizes = [1, 1, 1, 128], strides = [1, 1, 1, 1]} : vector<1x2x1x128xf32> to vector<1x1x1x128xf32>
    %352 = vector.shape_cast %351 : vector<1x1x1x128xf32> to vector<1x1x128xf32>
    %353 = vector.extract_strided_slice %281 {offsets = [1, 2, 0], sizes = [1, 1, 128], strides = [1, 1, 1]} : vector<3x3x128xf32> to vector<1x1x128xf32>
    %354 = vector.shape_cast %353 : vector<1x1x128xf32> to vector<128xf32>
    %355 = vector.shape_cast %354 : vector<128xf32> to vector<1x1x128xf32>
    %356 = arith.mulf %352, %355 : vector<1x1x128xf32>
    %357 = arith.addf %348, %356 : vector<1x1x128xf32>
    %358 = vector.extract_strided_slice %339 {offsets = [2, 0, 0], sizes = [2, 1, 128], strides = [1, 1, 1]} : vector<5x1x128xf32> to vector<2x1x128xf32>
    %359 = vector.shape_cast %358 : vector<2x1x128xf32> to vector<1x2x1x128xf32>
    %360 = vector.extract_strided_slice %359 {offsets = [0, 0, 0, 0], sizes = [1, 1, 1, 128], strides = [1, 1, 1, 1]} : vector<1x2x1x128xf32> to vector<1x1x1x128xf32>
    %361 = vector.shape_cast %360 : vector<1x1x1x128xf32> to vector<1x1x128xf32>
    %362 = vector.extract_strided_slice %281 {offsets = [2, 2, 0], sizes = [1, 1, 128], strides = [1, 1, 1]} : vector<3x3x128xf32> to vector<1x1x128xf32>
    %363 = vector.shape_cast %362 : vector<1x1x128xf32> to vector<128xf32>
    %364 = vector.shape_cast %363 : vector<128xf32> to vector<1x1x128xf32>
    %365 = arith.mulf %361, %364 : vector<1x1x128xf32>
    %366 = arith.addf %357, %365 : vector<1x1x128xf32>
    %c0_111 = arith.constant 0 : index
    %c0_112 = arith.constant 0 : index
    %367 = vector.load %arg17[%c0_111, %c0_112] : memref<1x128xf32, #tpu.memory_space<vmem>>, vector<1x128xf32>
    %368 = vector.shape_cast %367 : vector<1x128xf32> to vector<1x1x128xf32>
    %369 = arith.addf %366, %368 : vector<1x1x128xf32>
    %cst_113 = arith.constant 0.000000e+00 : f32
    %cst_114 = arith.constant 6.000000e+00 : f32
    %370 = vector.broadcast %cst_113 : f32 to vector<1x1x128xf32>
    %371 = arith.maximumf %370, %369 : vector<1x1x128xf32>
    %372 = vector.broadcast %cst_114 : f32 to vector<1x1x128xf32>
    %373 = arith.minimumf %372, %371 : vector<1x1x128xf32>
    %374 = vector.shape_cast %373 : vector<1x1x128xf32> to vector<1x128xf32>
    %375 = arith.truncf %374 : vector<1x128xf32> to vector<1x128xbf16>
    %c0_115 = arith.constant 0 : index
    %c0_116 = arith.constant 0 : index
    %376 = vector.load %arg18[%c0_115, %c0_116] : memref<128x128xbf16, #tpu.memory_space<vmem>>, vector<128x128xbf16>
    %cst_117 = arith.constant dense<0.000000e+00> : vector<1x128xf32>
    %377 = tpu.matmul %375, %376, %cst_117 {dimension_numbers = #tpu.dot_dimension_numbers<[1], [0], [0], [1], [0, 0, 1, 1], [], []>} : vector<1x128xbf16>, vector<128x128xbf16>, vector<1x128xf32> -> vector<1x128xf32>
    %c0_118 = arith.constant 0 : index
    %c0_119 = arith.constant 0 : index
    %378 = vector.load %arg19[%c0_118, %c0_119] : memref<1x128xf32, #tpu.memory_space<vmem>>, vector<1x128xf32>
    %379 = arith.addf %377, %378 : vector<1x128xf32>
    %cst_120 = arith.constant 0.000000e+00 : f32
    %cst_121 = arith.constant 6.000000e+00 : f32
    %380 = vector.broadcast %cst_120 : f32 to vector<1x128xf32>
    %381 = arith.maximumf %380, %379 : vector<1x128xf32>
    %382 = vector.broadcast %cst_121 : f32 to vector<1x128xf32>
    %383 = arith.minimumf %382, %381 : vector<1x128xf32>
    %384 = vector.shape_cast %383 : vector<1x128xf32> to vector<1x1x1x128xf32>
    %c0_122 = arith.constant 0 : index
    %c0_123 = arith.constant 0 : index
    %c0_124 = arith.constant 0 : index
    %c0_125 = arith.constant 0 : index
    %385 = vector.load %arg28[%c0_122, %c0_123, %c0_124, %c0_125] : memref<1x1x1x128xf32, #tpu.memory_space<vmem>>, vector<1x1x1x128xf32>
    tpu.vector_store %arg28[%c0_122, %c0_123, %c0_124, %c0_125], %384 {strides = array<i32>} : memref<1x1x1x128xf32, #tpu.memory_space<vmem>>, vector<1x1x1x128xf32>,
    %386 = vector.shape_cast %383 : vector<1x128xf32> to vector<1x1x128xf32>
    %387 = vector.shape_cast %386 : vector<1x1x128xf32> to vector<1x128xf32>
    %388 = arith.truncf %387 : vector<1x128xf32> to vector<1x128xbf16>
    %c0_126 = arith.constant 0 : index
    %c0_127 = arith.constant 0 : index
    %389 = vector.load %arg20[%c0_126, %c0_127] : memref<128x128xbf16, #tpu.memory_space<vmem>>, vector<128x128xbf16>
    %cst_128 = arith.constant dense<0.000000e+00> : vector<1x128xf32>
    %390 = tpu.matmul %388, %389, %cst_128 {dimension_numbers = #tpu.dot_dimension_numbers<[1], [0], [0], [1], [0, 0, 1, 1], [], []>} : vector<1x128xbf16>, vector<128x128xbf16>, vector<1x128xf32> -> vector<1x128xf32>
    %c0_129 = arith.constant 0 : index
    %c0_130 = arith.constant 0 : index
    %391 = vector.load %arg21[%c0_129, %c0_130] : memref<1x128xf32, #tpu.memory_space<vmem>>, vector<1x128xf32>
    %392 = arith.addf %390, %391 : vector<1x128xf32>
    %cst_131 = arith.constant 0.000000e+00 : f32
    %cst_132 = arith.constant 6.000000e+00 : f32
    %393 = vector.broadcast %cst_131 : f32 to vector<1x128xf32>
    %394 = arith.maximumf %393, %392 : vector<1x128xf32>
    %395 = vector.broadcast %cst_132 : f32 to vector<1x128xf32>
    %396 = arith.minimumf %395, %394 : vector<1x128xf32>
    %397 = vector.shape_cast %396 : vector<1x128xf32> to vector<1x1x128xf32>
    %cst_133 = arith.constant 0.000000e+00 : f32
    %398 = vector.broadcast %cst_133 : f32 to vector<4x3x128xf32>
    %c0_134 = arith.constant 0 : index
    %c0_135 = arith.constant 0 : index
    %c0_136 = arith.constant 0 : index
    %399 = vector.load %arg33[%c0_134, %c0_135, %c0_136] : memref<4x3x128xf32, #tpu.memory_space<vmem>>, vector<4x3x128xf32>
    tpu.vector_store %arg33[%c0_134, %c0_135, %c0_136], %398 {strides = array<i32>} : memref<4x3x128xf32, #tpu.memory_space<vmem>>, vector<4x3x128xf32>,
    %c1_137 = arith.constant 1 : index
    %c1_138 = arith.constant 1 : index
    %c0_139 = arith.constant 0 : index
    %400 = vector.load %arg33[%c1_137, %c1_138, %c0_139] : memref<4x3x128xf32, #tpu.memory_space<vmem>>, vector<1x1x128xf32>
    tpu.vector_store %arg33[%c1_137, %c1_138, %c0_139], %397 {strides = array<i32>} : memref<4x3x128xf32, #tpu.memory_space<vmem>>, vector<1x1x128xf32>,
    %c0_140 = arith.constant 0 : index
    %c0_141 = arith.constant 0 : index
    %c0_142 = arith.constant 0 : index
    %401 = vector.load %arg22[%c0_140, %c0_141, %c0_142] : memref<3x3x128xf32, #tpu.memory_space<vmem>>, vector<3x3x128xf32>
    %cst_143 = arith.constant 0.000000e+00 : f32
    %402 = vector.broadcast %cst_143 : f32 to vector<1x1x128xf32>
    %c0_144 = arith.constant 0 : index
    %c0_145 = arith.constant 0 : index
    %c0_146 = arith.constant 0 : index
    %403 = tpu.strided_load %arg33[%c0_144, %c0_145, %c0_146] {strides = array<i32: 1, 2, 1>} : memref<4x3x128xf32, #tpu.memory_space<vmem>>, vector<4x1x128xf32>
    %404 = vector.extract_strided_slice %403 {offsets = [0, 0, 0], sizes = [2, 1, 128], strides = [1, 1, 1]} : vector<4x1x128xf32> to vector<2x1x128xf32>
    %405 = vector.shape_cast %404 : vector<2x1x128xf32> to vector<1x2x1x128xf32>
    %406 = vector.extract_strided_slice %405 {offsets = [0, 0, 0, 0], sizes = [1, 1, 1, 128], strides = [1, 1, 1, 1]} : vector<1x2x1x128xf32> to vector<1x1x1x128xf32>
    %407 = vector.shape_cast %406 : vector<1x1x1x128xf32> to vector<1x1x128xf32>
    %408 = vector.extract_strided_slice %401 {offsets = [0, 0, 0], sizes = [1, 1, 128], strides = [1, 1, 1]} : vector<3x3x128xf32> to vector<1x1x128xf32>
    %409 = vector.shape_cast %408 : vector<1x1x128xf32> to vector<128xf32>
    %410 = vector.shape_cast %409 : vector<128xf32> to vector<1x1x128xf32>
    %411 = arith.mulf %407, %410 : vector<1x1x128xf32>
    %412 = arith.addf %402, %411 : vector<1x1x128xf32>
    %413 = vector.extract_strided_slice %403 {offsets = [1, 0, 0], sizes = [2, 1, 128], strides = [1, 1, 1]} : vector<4x1x128xf32> to vector<2x1x128xf32>
    %414 = vector.shape_cast %413 : vector<2x1x128xf32> to vector<1x2x1x128xf32>
    %415 = vector.extract_strided_slice %414 {offsets = [0, 0, 0, 0], sizes = [1, 1, 1, 128], strides = [1, 1, 1, 1]} : vector<1x2x1x128xf32> to vector<1x1x1x128xf32>
    %416 = vector.shape_cast %415 : vector<1x1x1x128xf32> to vector<1x1x128xf32>
    %417 = vector.extract_strided_slice %401 {offsets = [1, 0, 0], sizes = [1, 1, 128], strides = [1, 1, 1]} : vector<3x3x128xf32> to vector<1x1x128xf32>
    %418 = vector.shape_cast %417 : vector<1x1x128xf32> to vector<128xf32>
    %419 = vector.shape_cast %418 : vector<128xf32> to vector<1x1x128xf32>
    %420 = arith.mulf %416, %419 : vector<1x1x128xf32>
    %421 = arith.addf %412, %420 : vector<1x1x128xf32>
    %422 = vector.extract_strided_slice %403 {offsets = [2, 0, 0], sizes = [2, 1, 128], strides = [1, 1, 1]} : vector<4x1x128xf32> to vector<2x1x128xf32>
    %423 = vector.shape_cast %422 : vector<2x1x128xf32> to vector<1x2x1x128xf32>
    %424 = vector.extract_strided_slice %423 {offsets = [0, 0, 0, 0], sizes = [1, 1, 1, 128], strides = [1, 1, 1, 1]} : vector<1x2x1x128xf32> to vector<1x1x1x128xf32>
    %425 = vector.shape_cast %424 : vector<1x1x1x128xf32> to vector<1x1x128xf32>
    %426 = vector.extract_strided_slice %401 {offsets = [2, 0, 0], sizes = [1, 1, 128], strides = [1, 1, 1]} : vector<3x3x128xf32> to vector<1x1x128xf32>
    %427 = vector.shape_cast %426 : vector<1x1x128xf32> to vector<128xf32>
    %428 = vector.shape_cast %427 : vector<128xf32> to vector<1x1x128xf32>
    %429 = arith.mulf %425, %428 : vector<1x1x128xf32>
    %430 = arith.addf %421, %429 : vector<1x1x128xf32>
    %c0_147 = arith.constant 0 : index
    %c1_148 = arith.constant 1 : index
    %c0_149 = arith.constant 0 : index
    %431 = tpu.strided_load %arg33[%c0_147, %c1_148, %c0_149] {strides = array<i32: 1, 2, 1>} : memref<4x3x128xf32, #tpu.memory_space<vmem>>, vector<4x1x128xf32>
    %432 = vector.extract_strided_slice %431 {offsets = [0, 0, 0], sizes = [2, 1, 128], strides = [1, 1, 1]} : vector<4x1x128xf32> to vector<2x1x128xf32>
    %433 = vector.shape_cast %432 : vector<2x1x128xf32> to vector<1x2x1x128xf32>
    %434 = vector.extract_strided_slice %433 {offsets = [0, 0, 0, 0], sizes = [1, 1, 1, 128], strides = [1, 1, 1, 1]} : vector<1x2x1x128xf32> to vector<1x1x1x128xf32>
    %435 = vector.shape_cast %434 : vector<1x1x1x128xf32> to vector<1x1x128xf32>
    %436 = vector.extract_strided_slice %401 {offsets = [0, 1, 0], sizes = [1, 1, 128], strides = [1, 1, 1]} : vector<3x3x128xf32> to vector<1x1x128xf32>
    %437 = vector.shape_cast %436 : vector<1x1x128xf32> to vector<128xf32>
    %438 = vector.shape_cast %437 : vector<128xf32> to vector<1x1x128xf32>
    %439 = arith.mulf %435, %438 : vector<1x1x128xf32>
    %440 = arith.addf %430, %439 : vector<1x1x128xf32>
    %441 = vector.extract_strided_slice %431 {offsets = [1, 0, 0], sizes = [2, 1, 128], strides = [1, 1, 1]} : vector<4x1x128xf32> to vector<2x1x128xf32>
    %442 = vector.shape_cast %441 : vector<2x1x128xf32> to vector<1x2x1x128xf32>
    %443 = vector.extract_strided_slice %442 {offsets = [0, 0, 0, 0], sizes = [1, 1, 1, 128], strides = [1, 1, 1, 1]} : vector<1x2x1x128xf32> to vector<1x1x1x128xf32>
    %444 = vector.shape_cast %443 : vector<1x1x1x128xf32> to vector<1x1x128xf32>
    %445 = vector.extract_strided_slice %401 {offsets = [1, 1, 0], sizes = [1, 1, 128], strides = [1, 1, 1]} : vector<3x3x128xf32> to vector<1x1x128xf32>
    %446 = vector.shape_cast %445 : vector<1x1x128xf32> to vector<128xf32>
    %447 = vector.shape_cast %446 : vector<128xf32> to vector<1x1x128xf32>
    %448 = arith.mulf %444, %447 : vector<1x1x128xf32>
    %449 = arith.addf %440, %448 : vector<1x1x128xf32>
    %450 = vector.extract_strided_slice %431 {offsets = [2, 0, 0], sizes = [2, 1, 128], strides = [1, 1, 1]} : vector<4x1x128xf32> to vector<2x1x128xf32>
    %451 = vector.shape_cast %450 : vector<2x1x128xf32> to vector<1x2x1x128xf32>
    %452 = vector.extract_strided_slice %451 {offsets = [0, 0, 0, 0], sizes = [1, 1, 1, 128], strides = [1, 1, 1, 1]} : vector<1x2x1x128xf32> to vector<1x1x1x128xf32>
    %453 = vector.shape_cast %452 : vector<1x1x1x128xf32> to vector<1x1x128xf32>
    %454 = vector.extract_strided_slice %401 {offsets = [2, 1, 0], sizes = [1, 1, 128], strides = [1, 1, 1]} : vector<3x3x128xf32> to vector<1x1x128xf32>
    %455 = vector.shape_cast %454 : vector<1x1x128xf32> to vector<128xf32>
    %456 = vector.shape_cast %455 : vector<128xf32> to vector<1x1x128xf32>
    %457 = arith.mulf %453, %456 : vector<1x1x128xf32>
    %458 = arith.addf %449, %457 : vector<1x1x128xf32>
    %c0_150 = arith.constant 0 : index
    %c2_151 = arith.constant 2 : index
    %c0_152 = arith.constant 0 : index
    %459 = tpu.strided_load %arg33[%c0_150, %c2_151, %c0_152] {strides = array<i32: 1, 2, 1>} : memref<4x3x128xf32, #tpu.memory_space<vmem>>, vector<4x1x128xf32>
    %460 = vector.extract_strided_slice %459 {offsets = [0, 0, 0], sizes = [2, 1, 128], strides = [1, 1, 1]} : vector<4x1x128xf32> to vector<2x1x128xf32>
    %461 = vector.shape_cast %460 : vector<2x1x128xf32> to vector<1x2x1x128xf32>
    %462 = vector.extract_strided_slice %461 {offsets = [0, 0, 0, 0], sizes = [1, 1, 1, 128], strides = [1, 1, 1, 1]} : vector<1x2x1x128xf32> to vector<1x1x1x128xf32>
    %463 = vector.shape_cast %462 : vector<1x1x1x128xf32> to vector<1x1x128xf32>
    %464 = vector.extract_strided_slice %401 {offsets = [0, 2, 0], sizes = [1, 1, 128], strides = [1, 1, 1]} : vector<3x3x128xf32> to vector<1x1x128xf32>
    %465 = vector.shape_cast %464 : vector<1x1x128xf32> to vector<128xf32>
    %466 = vector.shape_cast %465 : vector<128xf32> to vector<1x1x128xf32>
    %467 = arith.mulf %463, %466 : vector<1x1x128xf32>
    %468 = arith.addf %458, %467 : vector<1x1x128xf32>
    %469 = vector.extract_strided_slice %459 {offsets = [1, 0, 0], sizes = [2, 1, 128], strides = [1, 1, 1]} : vector<4x1x128xf32> to vector<2x1x128xf32>
    %470 = vector.shape_cast %469 : vector<2x1x128xf32> to vector<1x2x1x128xf32>
    %471 = vector.extract_strided_slice %470 {offsets = [0, 0, 0, 0], sizes = [1, 1, 1, 128], strides = [1, 1, 1, 1]} : vector<1x2x1x128xf32> to vector<1x1x1x128xf32>
    %472 = vector.shape_cast %471 : vector<1x1x1x128xf32> to vector<1x1x128xf32>
    %473 = vector.extract_strided_slice %401 {offsets = [1, 2, 0], sizes = [1, 1, 128], strides = [1, 1, 1]} : vector<3x3x128xf32> to vector<1x1x128xf32>
    %474 = vector.shape_cast %473 : vector<1x1x128xf32> to vector<128xf32>
    %475 = vector.shape_cast %474 : vector<128xf32> to vector<1x1x128xf32>
    %476 = arith.mulf %472, %475 : vector<1x1x128xf32>
    %477 = arith.addf %468, %476 : vector<1x1x128xf32>
    %478 = vector.extract_strided_slice %459 {offsets = [2, 0, 0], sizes = [2, 1, 128], strides = [1, 1, 1]} : vector<4x1x128xf32> to vector<2x1x128xf32>
    %479 = vector.shape_cast %478 : vector<2x1x128xf32> to vector<1x2x1x128xf32>
    %480 = vector.extract_strided_slice %479 {offsets = [0, 0, 0, 0], sizes = [1, 1, 1, 128], strides = [1, 1, 1, 1]} : vector<1x2x1x128xf32> to vector<1x1x1x128xf32>
    %481 = vector.shape_cast %480 : vector<1x1x1x128xf32> to vector<1x1x128xf32>
    %482 = vector.extract_strided_slice %401 {offsets = [2, 2, 0], sizes = [1, 1, 128], strides = [1, 1, 1]} : vector<3x3x128xf32> to vector<1x1x128xf32>
    %483 = vector.shape_cast %482 : vector<1x1x128xf32> to vector<128xf32>
    %484 = vector.shape_cast %483 : vector<128xf32> to vector<1x1x128xf32>
    %485 = arith.mulf %481, %484 : vector<1x1x128xf32>
    %486 = arith.addf %477, %485 : vector<1x1x128xf32>
    %c0_153 = arith.constant 0 : index
    %c0_154 = arith.constant 0 : index
    %487 = vector.load %arg23[%c0_153, %c0_154] : memref<1x128xf32, #tpu.memory_space<vmem>>, vector<1x128xf32>
    %488 = vector.shape_cast %487 : vector<1x128xf32> to vector<1x1x128xf32>
    %489 = arith.addf %486, %488 : vector<1x1x128xf32>
    %cst_155 = arith.constant 0.000000e+00 : f32
    %cst_156 = arith.constant 6.000000e+00 : f32
    %490 = vector.broadcast %cst_155 : f32 to vector<1x1x128xf32>
    %491 = arith.maximumf %490, %489 : vector<1x1x128xf32>
    %492 = vector.broadcast %cst_156 : f32 to vector<1x1x128xf32>
    %493 = arith.minimumf %492, %491 : vector<1x1x128xf32>
    %494 = vector.shape_cast %493 : vector<1x1x128xf32> to vector<1x128xf32>
    %495 = arith.truncf %494 : vector<1x128xf32> to vector<1x128xbf16>
    %c0_157 = arith.constant 0 : index
    %c0_158 = arith.constant 0 : index
    %496 = vector.load %arg24[%c0_157, %c0_158] : memref<128x128xbf16, #tpu.memory_space<vmem>>, vector<128x128xbf16>
    %cst_159 = arith.constant dense<0.000000e+00> : vector<1x128xf32>
    %497 = tpu.matmul %495, %496, %cst_159 {dimension_numbers = #tpu.dot_dimension_numbers<[1], [0], [0], [1], [0, 0, 1, 1], [], []>} : vector<1x128xbf16>, vector<128x128xbf16>, vector<1x128xf32> -> vector<1x128xf32>
    %c0_160 = arith.constant 0 : index
    %c0_161 = arith.constant 0 : index
    %498 = vector.load %arg25[%c0_160, %c0_161] : memref<1x128xf32, #tpu.memory_space<vmem>>, vector<1x128xf32>
    %499 = arith.addf %497, %498 : vector<1x128xf32>
    %cst_162 = arith.constant 0.000000e+00 : f32
    %cst_163 = arith.constant 6.000000e+00 : f32
    %500 = vector.broadcast %cst_162 : f32 to vector<1x128xf32>
    %501 = arith.maximumf %500, %499 : vector<1x128xf32>
    %502 = vector.broadcast %cst_163 : f32 to vector<1x128xf32>
    %503 = arith.minimumf %502, %501 : vector<1x128xf32>
    %504 = vector.shape_cast %503 : vector<1x128xf32> to vector<1x1x1x128xf32>
    %c0_164 = arith.constant 0 : index
    %c0_165 = arith.constant 0 : index
    %c0_166 = arith.constant 0 : index
    %c0_167 = arith.constant 0 : index
    %505 = vector.load %arg29[%c0_164, %c0_165, %c0_166, %c0_167] : memref<1x1x1x128xf32, #tpu.memory_space<vmem>>, vector<1x1x1x128xf32>
    tpu.vector_store %arg29[%c0_164, %c0_165, %c0_166, %c0_167], %504 {strides = array<i32>} : memref<1x1x1x128xf32, #tpu.memory_space<vmem>>, vector<1x1x1x128xf32>,
    return
  }
  func.func @transform_0(%arg0: i32) -> (i32, i32, i32, i32) {
    %c0_i32 = arith.constant 0 : i32
    %c0_i32_0 = arith.constant 0 : i32
    %c0_i32_1 = arith.constant 0 : i32
    %c0_i32_2 = arith.constant 0 : i32
    return %arg0, %c0_i32, %c0_i32_0, %c0_i32_1 : i32, i32, i32, i32
  }
  func.func @transform_1(%arg0: i32) -> (i32, i32) {
    %c0_i32 = arith.constant 0 : i32
    %c0_i32_0 = arith.constant 0 : i32
    %c0_i32_1 = arith.constant 0 : i32
    return %c0_i32, %c0_i32_0 : i32, i32
  }
  func.func @transform_2(%arg0: i32) -> (i32, i32) {
    %c0_i32 = arith.constant 0 : i32
    %c0_i32_0 = arith.constant 0 : i32
    %c0_i32_1 = arith.constant 0 : i32
    return %c0_i32, %c0_i32_0 : i32, i32
  }
  func.func @transform_3(%arg0: i32) -> (i32, i32, i32) {
    %c0_i32 = arith.constant 0 : i32
    %c0_i32_0 = arith.constant 0 : i32
    %c0_i32_1 = arith.constant 0 : i32
    %c0_i32_2 = arith.constant 0 : i32
    return %c0_i32, %c0_i32_0, %c0_i32_1 : i32, i32, i32
  }
  func.func @transform_4(%arg0: i32) -> (i32, i32) {
    %c0_i32 = arith.constant 0 : i32
    %c0_i32_0 = arith.constant 0 : i32
    %c0_i32_1 = arith.constant 0 : i32
    return %c0_i32, %c0_i32_0 : i32, i32
  }
  func.func @transform_5(%arg0: i32) -> (i32, i32) {
    %c0_i32 = arith.constant 0 : i32
    %c0_i32_0 = arith.constant 0 : i32
    %c0_i32_1 = arith.constant 0 : i32
    return %c0_i32, %c0_i32_0 : i32, i32
  }
  func.func @transform_6(%arg0: i32) -> (i32, i32) {
    %c0_i32 = arith.constant 0 : i32
    %c0_i32_0 = arith.constant 0 : i32
    %c0_i32_1 = arith.constant 0 : i32
    return %c0_i32, %c0_i32_0 : i32, i32
  }
  func.func @transform_7(%arg0: i32) -> (i32, i32) {
    %c0_i32 = arith.constant 0 : i32
    %c0_i32_0 = arith.constant 0 : i32
    %c0_i32_1 = arith.constant 0 : i32
    return %c0_i32, %c0_i32_0 : i32, i32
  }
  func.func @transform_8(%arg0: i32) -> (i32, i32) {
    %c0_i32 = arith.constant 0 : i32
    %c0_i32_0 = arith.constant 0 : i32
    %c0_i32_1 = arith.constant 0 : i32
    return %c0_i32, %c0_i32_0 : i32, i32
  }
  func.func @transform_9(%arg0: i32) -> (i32, i32, i32) {
    %c0_i32 = arith.constant 0 : i32
    %c0_i32_0 = arith.constant 0 : i32
    %c0_i32_1 = arith.constant 0 : i32
    %c0_i32_2 = arith.constant 0 : i32
    return %c0_i32, %c0_i32_0, %c0_i32_1 : i32, i32, i32
  }
  func.func @transform_10(%arg0: i32) -> (i32, i32) {
    %c0_i32 = arith.constant 0 : i32
    %c0_i32_0 = arith.constant 0 : i32
    %c0_i32_1 = arith.constant 0 : i32
    return %c0_i32, %c0_i32_0 : i32, i32
  }
  func.func @transform_11(%arg0: i32) -> (i32, i32) {
    %c0_i32 = arith.constant 0 : i32
    %c0_i32_0 = arith.constant 0 : i32
    %c0_i32_1 = arith.constant 0 : i32
    return %c0_i32, %c0_i32_0 : i32, i32
  }
  func.func @transform_12(%arg0: i32) -> (i32, i32) {
    %c0_i32 = arith.constant 0 : i32
    %c0_i32_0 = arith.constant 0 : i32
    %c0_i32_1 = arith.constant 0 : i32
    return %c0_i32, %c0_i32_0 : i32, i32
  }
  func.func @transform_13(%arg0: i32) -> (i32, i32) {
    %c0_i32 = arith.constant 0 : i32
    %c0_i32_0 = arith.constant 0 : i32
    %c0_i32_1 = arith.constant 0 : i32
    return %c0_i32, %c0_i32_0 : i32, i32
  }
  func.func @transform_14(%arg0: i32) -> (i32, i32) {
    %c0_i32 = arith.constant 0 : i32
    %c0_i32_0 = arith.constant 0 : i32
    %c0_i32_1 = arith.constant 0 : i32
    return %c0_i32, %c0_i32_0 : i32, i32
  }
  func.func @transform_15(%arg0: i32) -> (i32, i32, i32) {
    %c0_i32 = arith.constant 0 : i32
    %c0_i32_0 = arith.constant 0 : i32
    %c0_i32_1 = arith.constant 0 : i32
    %c0_i32_2 = arith.constant 0 : i32
    return %c0_i32, %c0_i32_0, %c0_i32_1 : i32, i32, i32
  }
  func.func @transform_16(%arg0: i32) -> (i32, i32) {
    %c0_i32 = arith.constant 0 : i32
    %c0_i32_0 = arith.constant 0 : i32
    %c0_i32_1 = arith.constant 0 : i32
    return %c0_i32, %c0_i32_0 : i32, i32
  }
  func.func @transform_17(%arg0: i32) -> (i32, i32) {
    %c0_i32 = arith.constant 0 : i32
    %c0_i32_0 = arith.constant 0 : i32
    %c0_i32_1 = arith.constant 0 : i32
    return %c0_i32, %c0_i32_0 : i32, i32
  }
  func.func @transform_18(%arg0: i32) -> (i32, i32) {
    %c0_i32 = arith.constant 0 : i32
    %c0_i32_0 = arith.constant 0 : i32
    %c0_i32_1 = arith.constant 0 : i32
    return %c0_i32, %c0_i32_0 : i32, i32
  }
  func.func @transform_19(%arg0: i32) -> (i32, i32) {
    %c0_i32 = arith.constant 0 : i32
    %c0_i32_0 = arith.constant 0 : i32
    %c0_i32_1 = arith.constant 0 : i32
    return %c0_i32, %c0_i32_0 : i32, i32
  }
  func.func @transform_20(%arg0: i32) -> (i32, i32) {
    %c0_i32 = arith.constant 0 : i32
    %c0_i32_0 = arith.constant 0 : i32
    %c0_i32_1 = arith.constant 0 : i32
    return %c0_i32, %c0_i32_0 : i32, i32
  }
  func.func @transform_21(%arg0: i32) -> (i32, i32, i32) {
    %c0_i32 = arith.constant 0 : i32
    %c0_i32_0 = arith.constant 0 : i32
    %c0_i32_1 = arith.constant 0 : i32
    %c0_i32_2 = arith.constant 0 : i32
    return %c0_i32, %c0_i32_0, %c0_i32_1 : i32, i32, i32
  }
  func.func @transform_22(%arg0: i32) -> (i32, i32) {
    %c0_i32 = arith.constant 0 : i32
    %c0_i32_0 = arith.constant 0 : i32
    %c0_i32_1 = arith.constant 0 : i32
    return %c0_i32, %c0_i32_0 : i32, i32
  }
  func.func @transform_23(%arg0: i32) -> (i32, i32) {
    %c0_i32 = arith.constant 0 : i32
    %c0_i32_0 = arith.constant 0 : i32
    %c0_i32_1 = arith.constant 0 : i32
    return %c0_i32, %c0_i32_0 : i32, i32
  }
  func.func @transform_24(%arg0: i32) -> (i32, i32) {
    %c0_i32 = arith.constant 0 : i32
    %c0_i32_0 = arith.constant 0 : i32
    %c0_i32_1 = arith.constant 0 : i32
    return %c0_i32, %c0_i32_0 : i32, i32
  }
  func.func @transform_25(%arg0: i32) -> (i32, i32, i32, i32) {
    %c0_i32 = arith.constant 0 : i32
    %c0_i32_0 = arith.constant 0 : i32
    %c0_i32_1 = arith.constant 0 : i32
    %c0_i32_2 = arith.constant 0 : i32
    return %arg0, %c0_i32, %c0_i32_0, %c0_i32_1 : i32, i32, i32, i32
  }
  func.func @transform_26(%arg0: i32) -> (i32, i32, i32, i32) {
    %c0_i32 = arith.constant 0 : i32
    %c0_i32_0 = arith.constant 0 : i32
    %c0_i32_1 = arith.constant 0 : i32
    %c0_i32_2 = arith.constant 0 : i32
    return %arg0, %c0_i32, %c0_i32_0, %c0_i32_1 : i32, i32, i32, i32
  }
  func.func @transform_27(%arg0: i32) -> (i32, i32, i32, i32) {
    %c0_i32 = arith.constant 0 : i32
    %c0_i32_0 = arith.constant 0 : i32
    %c0_i32_1 = arith.constant 0 : i32
    %c0_i32_2 = arith.constant 0 : i32
    return %arg0, %c0_i32, %c0_i32_0, %c0_i32_1 : i32, i32, i32, i32
  }
  func.func @transform_28(%arg0: i32) -> (i32, i32, i32, i32) {
    %c0_i32 = arith.constant 0 : i32
    %c0_i32_0 = arith.constant 0 : i32
    %c0_i32_1 = arith.constant 0 : i32
    %c0_i32_2 = arith.constant 0 : i32
    return %arg0, %c0_i32, %c0_i32_0, %c0_i32_1 : i32, i32, i32, i32
  }
}

</mosaic_0001>

<bundles_post_ra>
// kernel: tpu_custom_call.1
= control target key start
LH: loop header
LB: loop body
LE: loop exit
PB: predicated region body
PF: predicated region fallthrough
CT: control target
= control target key end

     0   :  { %s4635_s0 = inlined_call_operand.hbm [shape: f32[2,8,8,64], index: 0, kind: input, shape index: {}]   ;;  %s4636_s1 = inlined_call_operand.hbm [shape: bf16[64,128], index: 1, kind: input, shape index: {}]   ;;  %s4637_s2 = inlined_call_operand.vmem [shape: f32[1,128], index: 2, kind: input, shape index: {}]   ;;  %s4638_s3 = inlined_call_operand.hbm [shape: f32[3,3,128], index: 3, kind: input, shape index: {}]   ;;  %s4639_s4 = inlined_call_operand.vmem [shape: f32[1,128], index: 4, kind: input, shape index: {}]   ;;  %s4640_s5 = inlined_call_operand.hbm [shape: bf16[128,128], index: 5, kind: input, shape index: {}]   ;;  %s4641_s6 = inlined_call_operand.hbm [shape: f32[1,128], index: 6, kind: input, shape index: {}]   ;;  %s4642_s7 = inlined_call_operand.hbm [shape: bf16[128,128], index: 7, kind: input, shape index: {}]   ;;  %s4643_s8 = inlined_call_operand.hbm [shape: f32[1,128], index: 8, kind: input, shape index: {}]   ;;  %s4644_s9 = inlined_call_operand.hbm [shape: f32[3,3,128], index: 9, kind: input, shape index: {}]   ;;  %s4645_s10 = inlined_call_operand.hbm [shape: f32[1,128], index: 10, kind: input, shape index: {}]   ;;  %s4646_s11 = inlined_call_operand.hbm [shape: bf16[128,128], index: 11, kind: input, shape index: {}]   ;;  %s4647_s12 = inlined_call_operand.hbm [shape: f32[1,128], index: 12, kind: input, shape index: {}]   ;;  %s4648_s13 = inlined_call_operand.hbm [shape: bf16[128,128], index: 13, kind: input, shape index: {}]   ;;  %s4649_s14 = inlined_call_operand.hbm [shape: f32[1,128], index: 14, kind: input, shape index: {}]   ;;  %s4650_s15 = inlined_call_operand.vmem [shape: f32[3,3,128], index: 15, kind: input, shape index: {}]   ;;  %s4651_s16 = inlined_call_operand.vmem [shape: f32[1,128], index: 16, kind: input, shape index: {}]   ;;  %s4652_s17 = inlined_call_operand.hbm [shape: bf16[128,128], index: 17, kind: input, shape index: {}]   ;;  %s4653_s18 = inlined_call_operand.vmem [shape: f32[1,128], index: 18, kind: input, shape index: {}]   ;;  %s4654_s19 = inlined_call_operand.hbm [shape: bf16[128,128], index: 19, kind: input, shape index: {}]   ;;  %s4655_s20 = inlined_call_operand.vmem [shape: f32[1,128], index: 20, kind: input, shape index: {}]   ;;  %s4656_s21 = inlined_call_operand.hbm [shape: f32[3,3,128], index: 21, kind: input, shape index: {}]   ;;  %s4657_s22 = inlined_call_operand.vmem [shape: f32[1,128], index: 22, kind: input, shape index: {}]   ;;  %s4658_s23 = inlined_call_operand.hbm [shape: bf16[128,128], index: 23, kind: input, shape index: {}]   ;;  %s4659_s24 = inlined_call_operand.vmem [shape: f32[1,128], index: 24, kind: input, shape index: {}]   ;;  %s4660_s25 = inlined_call_operand.hbm [shape: f32[2,4,4,128], index: 25, kind: output, shape index: {0}]   ;;  %s4661_s26 = inlined_call_operand.hbm [shape: f32[2,2,2,128], index: 26, kind: output, shape index: {1}]   ;;  %s4662_s27 = inlined_call_operand.hbm [shape: f32[2,1,1,128], index: 27, kind: output, shape index: {2}]   ;;  %s4663_s28 = inlined_call_operand.hbm [shape: f32[2,1,1,128], index: 28, kind: output, shape index: {3}]  }
   0x1   :  { %4672 = sst [smem:[#allocation51_spill]] %s4635_s0 }
   0x2   :  { %4673 = sst [smem:[#allocation52_spill]] %s4636_s1 }
   0x3   :  { %4674 = sst [smem:[#allocation53_spill]] %s4637_s2 }
   0x4   :  { %4675 = sst [smem:[#allocation54_spill]] %s4638_s3 }
   0x5   :  { %4676 = sst [smem:[#allocation55_spill]] %s4639_s4 }
   0x6   :  { %4677 = sst [smem:[#allocation56_spill]] %s4640_s5 }
   0x7   :  { %4678 = sst [smem:[#allocation57_spill]] %s4641_s6 }
   0x8   :  { %4679 = sst [smem:[#allocation58_spill]] %s4642_s7 }
   0x9   :  { %4680 = sst [smem:[#allocation59_spill]] %s4643_s8 }
   0xa   :  { %4681 = sst [smem:[#allocation60_spill]] %s4644_s9 }
   0xb   :  { %4682 = sst [smem:[#allocation61_spill]] %s4645_s10 }
   0xc   :  { %4683 = sst [smem:[#allocation62_spill]] %s4646_s11 }
   0xd   :  { %4684 = sst [smem:[#allocation63_spill]] %s4647_s12 }
   0xe   :  { %4685 = sst [smem:[#allocation64_spill]] %s4648_s13 }
   0xf   :  { %4686 = sst [smem:[#allocation65_spill]] %s4649_s14 }
  0x10   :  { %4687 = sst [smem:[#allocation66_spill]] %s4650_s15 }
  0x11   :  { %4688 = sst [smem:[#allocation67_spill]] %s4651_s16 }
  0x12   :  { %4689 = sst [smem:[#allocation68_spill]] %s4652_s17 }
  0x13   :  { %4690 = sst [smem:[#allocation69_spill]] %s4653_s18 }
  0x14   :  { %4691 = sst [smem:[#allocation70_spill]] %s4654_s19 }
  0x15   :  { %4692 = sst [smem:[#allocation71_spill]] %s4655_s20 }
  0x16   :  { %4693 = sst [smem:[#allocation72_spill]] %s4656_s21 }
  0x17   :  { %4694 = sst [smem:[#allocation73_spill]] %s4657_s22 }
  0x18   :  { %4695 = sst [smem:[#allocation74_spill]] %s4659_s24 }
  0x19   :  { %4696 = sst [smem:[#allocation75_spill]] %s4660_s25 }
  0x1a   :  { %4697 = sst [smem:[#allocation76_spill]] %s4661_s26 }
  0x1b   :  { %4698 = sst [smem:[#allocation77_spill]] %s4662_s27 }
  0x1c   :  { %4699 = sst [smem:[#allocation78_spill]] %s4663_s28 }
  0x1d   :  { %34 = vsyncpa [#allocation7], 0 }
  0x1e   :  { %36 = vsyncpa [#allocation7 + $0x1], 0 }
  0x1f   :  { %37 = vsyncpa [#allocation10], 0 }
  0x20   :  { %38 = vsyncpa [#allocation13], 0 }
  0x21   :  { %39 = vsyncpa [#allocation16], 0 }
  0x22   :  { %40 = vsyncpa [#allocation19], 0 }
  0x23   :  { %41 = vsyncpa [#allocation22], 0 }
  0x24   :  { %42 = vsyncpa [#allocation25], 0 }
  0x25   :  { %43 = vsyncpa [#allocation28], 0 }
  0x26   :  { %44 = vsyncpa [#allocation31], 0 }
  0x27   :  { %45 = vsyncpa [#allocation8], 0 }
  0x28   :  { %47 = vsyncpa [#allocation8 + $0x1], 0 }
  0x29   :  { %48 = vsyncpa [#allocation35], 0 }
  0x2a   :  { %50 = vsyncpa [#allocation35 + $0x1], 0 }
  0x2b   :  { %51 = vsyncpa [#allocation38], 0 }
  0x2c   :  { %53 = vsyncpa [#allocation38 + $0x1], 0  ;;  %s4147_s8 = smov 0   ;;  %s4149_s5 = smov 0  }
  0x2d   :  { %s4151_s9 = smov 0   ;;  %s4153_s30 = smov 0  }
  0x2e LB: > { %s4700_s10 = sld [smem:[#allocation52_spill]]  ;;  %s4171_s11 = sadd.s32 4294967295, %s3975_s30   ;;  %s3975_s30 = sphi %s4153_s30, %s4741_s30   ;;  %s3971_s9 = sphi %s4151_s9, %s4740_s9   ;;  %s3967_s5 = sphi %s4149_s5, %s4739_s5   ;;  %s3963_s8 = sphi %s4147_s8, %s4738_s8  }
  0x2f   : > { %p2681_p0 = scmp.ge.s32.totalorder %s3975_s30, 1  ;;  %p80_p1 = scmp.eq.s32.totalorder %s4171_s11, 0 }
  0x30   : > { %p698_p2 = scmp.lt.s32.totalorder %s3975_s30, 3  ;;  %s3977_s2 = smov [#allocation9]  }
  0x31   : > { %s711_s7 = sshll.u32 %s3977_s2, 4  ;;  %s4702_s4 = sld [smem:[#allocation56_spill]]  ;;  %s712_s7 = int_to_ptr.vmem [resolvable:$true] %s711_s7 }
  0x32   : > { %p4176_p3 = pnand %p2681_p0, %p698_p2  ;;  %s4704_s2 = sld [smem:[#allocation58_spill]] }
  0x33   : > { %s3978_s27 = smov [#allocation12]   ;;  %s3979_s26 = smov 64  }
  0x34   : > { %s709_s0 = sshll.u32 %s4700_s10, 4  ;;  %p3111_p4 = pneg %p4176_p3  ;;  %s710_s0 = int_to_ptr.hbm [resolvable:$true] %s709_s0 }
  0x35   : > { %s745_s25 = sshll.u32 %s3978_s27, 4  ;;  %s3980_s22 = smov 4   ;;  %s746_s25 = int_to_ptr.vmem [resolvable:$true] %s745_s25 }
  0x36   : > { %p4188_p6 = pnand %p3111_p4, %p80_p1  ;;  %s4705_s1 = sld [smem:[#allocation60_spill]] }
  0x37   : > { %s743_s3 = sshll.u32 %s4702_s4, 4  ;;  %s3981_s27 = smov [#allocation15]   ;;  %s744_s3 = int_to_ptr.hbm [resolvable:$true] %s743_s3 }
  0x38   : > { %s769_s24 = sshll.u32 %s4704_s2, 4  ;;  %s771_s10 = sshll.u32 %s3981_s27, 4  ;;  %s770_s24 = int_to_ptr.hbm [resolvable:$true] %s769_s24  ;;  %s772_s10 = int_to_ptr.vmem [resolvable:$true] %s771_s10 }
  0x39   : > { %3114 = dma.hbm_to_vmem [thread:$0]  (!%p4188_p6), %s710_s0, 512, %s712_s7, [#allocation10], %s3979_s26, %s3979_s26, %s3980_s22  }
  0x3a   : > { %3120 = dma.hbm_to_vmem [thread:$0]  (!%p4188_p6), %s744_s3, 1024, %s746_s25, [#allocation13], %s3979_s26, %s3979_s26, %s3980_s22  }
  0x3b   : > { %3126 = dma.hbm_to_vmem [thread:$0]  (!%p4188_p6), %s770_s24, 1024, %s772_s10, [#allocation16], %s3979_s26, %s3979_s26, %s3980_s22  }
  0x3c   : > { %s795_s4 = sshll.u32 %s4705_s1, 4  ;;  %s3982_s0 = smov [#allocation18]   ;;  %s796_s4 = int_to_ptr.hbm [resolvable:$true] %s795_s4 }
  0x3d   : > { %s797_s7 = sshll.u32 %s3982_s0, 4  ;;  %s4706_s18 = sld [smem:[#allocation62_spill]]  ;;  %s798_s7 = int_to_ptr.vmem [resolvable:$true] %s797_s7 }
  0x3e   : > { %3132 = dma.hbm_to_vmem [thread:$0]  (!%p4188_p6), %s796_s4, 192, %s798_s7, [#allocation19], %s3979_s26, %s3979_s26, %s3980_s22  }
  0x3f   : > { %s4707_s13 = sld [smem:[#allocation64_spill]]  ;;  %s3983_s1 = smov [#allocation21]  }
  0x40   : > { %s823_s24 = sshll.u32 %s3983_s1, 4  ;;  %s4708_s17 = sld [smem:[#allocation68_spill]]  ;;  %s824_s24 = int_to_ptr.vmem [resolvable:$true] %s823_s24 }
  0x41   : > { %s4709_s21 = sld [smem:[#allocation72_spill]]  ;;  %s3985_s3 = smov [#allocation27]  }
  0x42   : > { %s3986_s12 = smov [#allocation30]   ;;  %s4710_s27 = sld [smem:[#allocation54_spill]] }
  0x43   : > { %s821_s25 = sshll.u32 %s4706_s18, 4  ;;  %s3984_s18 = smov [#allocation24]   ;;  %s822_s25 = int_to_ptr.hbm [resolvable:$true] %s821_s25 }
  0x44   : > { %3138 = dma.hbm_to_vmem [thread:$0]  (!%p4188_p6), %s822_s25, 1024, %s824_s24, [#allocation22], %s3979_s26, %s3979_s26, %s3980_s22  }
  0x45   : > { %s847_s28 = sshll.u32 %s4707_s13, 4  ;;  %s849_s20 = sshll.u32 %s3984_s18, 4  ;;  %s848_s28 = int_to_ptr.hbm [resolvable:$true] %s847_s28  ;;  %s850_s20 = int_to_ptr.vmem [resolvable:$true] %s849_s20 }
  0x46   : > { %s879_s4 = sshll.u32 %s4708_s17, 4  ;;  %s881_s25 = sshll.u32 %s3985_s3, 4  ;;  %s880_s4 = int_to_ptr.hbm [resolvable:$true] %s879_s4  ;;  %s882_s25 = int_to_ptr.vmem [resolvable:$true] %s881_s25 }
  0x47   : > { %3144 = dma.hbm_to_vmem [thread:$0]  (!%p4188_p6), %s848_s28, 1024, %s850_s20, [#allocation25], %s3979_s26, %s3979_s26, %s3980_s22  }
  0x48   : > { %s913_s2 = sshll.u32 %s4709_s21, 4  ;;  %s915_s1 = sshll.u32 %s3986_s12, 4  ;;  %s914_s2 = int_to_ptr.hbm [resolvable:$true] %s913_s2  ;;  %s916_s1 = int_to_ptr.vmem [resolvable:$true] %s915_s1 }
  0x49   : > { %3150 = dma.hbm_to_vmem [thread:$0]  (!%p4188_p6), %s880_s4, 1024, %s882_s25, [#allocation28], %s3979_s26, %s3979_s26, %s3980_s22  }
  0x4a   : > { %s726_s28 = sshll.u32 %s4710_s27, 4  ;;  %s4711_s0 = sld [smem:[#allocation57_spill]]  ;;  %s727_s28 = int_to_ptr.hbm [resolvable:$true] %s726_s28 }
  0x4b   : > { %3156 = dma.hbm_to_vmem [thread:$0]  (!%p4188_p6), %s914_s2, 192, %s916_s1, [#allocation31], %s3979_s26, %s3979_s26, %s3980_s22  }
  0x4c   : > { %s3987_s3 = smov [#allocation11]   ;;  %s3988_s25 = smov [#allocation14]  }
  0x4d   : > { %s728_s4 = sshll.u32 %s3987_s3, 4  ;;  %s760_s12 = sshll.u32 %s3988_s25, 4  ;;  %s729_s4 = int_to_ptr.vmem [resolvable:$true] %s728_s4  ;;  %s761_s12 = int_to_ptr.vmem [resolvable:$true] %s760_s12 }
  0x4e   : > { %3117 = dma.hbm_to_vmem [thread:$0]  (!%p4188_p6), %s727_s28, 192, %s729_s4, [#allocation10], %s3979_s26, %s3979_s26, %s3980_s22  }
  0x4f   : > { %s4712_s27 = sld [smem:[#allocation59_spill]]  ;;  %s3989_s3 = smov [#allocation17]  }
  0x50   : > { %s758_s7 = sshll.u32 %s4711_s0, 4  ;;  %s4713_s10 = sld [smem:[#allocation61_spill]]  ;;  %s759_s7 = int_to_ptr.hbm [resolvable:$true] %s758_s7 }
  0x51   : > { %3123 = dma.hbm_to_vmem [thread:$0]  (!%p4188_p6), %s759_s7, 16, %s761_s12, [#allocation13]  }
  0x52   : > { %s786_s13 = sshll.u32 %s3989_s3, 4  ;;  %s3990_s28 = smov [#allocation20]   ;;  %s787_s13 = int_to_ptr.vmem [resolvable:$true] %s786_s13 }
  0x53   : > { %s812_s4 = sshll.u32 %s3990_s28, 4  ;;  %s4714_s18 = sld [smem:[#allocation63_spill]]  ;;  %s813_s4 = int_to_ptr.vmem [resolvable:$true] %s812_s4 }
  0x54   : > { %s4715_s14 = sld [smem:[#allocation65_spill]]  ;;  %s3991_s20 = smov [#allocation23]  }
  0x55   : > { %s784_s2 = sshll.u32 %s4712_s27, 4  ;;  %s4716_s19 = sld [smem:[#allocation70_spill]]  ;;  %s785_s2 = int_to_ptr.hbm [resolvable:$true] %s784_s2 }
  0x56   : > { %s810_s0 = sshll.u32 %s4713_s10, 4  ;;  %s838_s10 = sshll.u32 %s3991_s20, 4  ;;  %s811_s0 = int_to_ptr.hbm [resolvable:$true] %s810_s0  ;;  %s839_s10 = int_to_ptr.vmem [resolvable:$true] %s838_s10 }
  0x57   : > { %3129 = dma.hbm_to_vmem [thread:$0]  (!%p4188_p6), %s785_s2, 16, %s787_s13, [#allocation16]  }
  0x58   : > { %3135 = dma.hbm_to_vmem [thread:$0]  (!%p4188_p6), %s811_s0, 16, %s813_s4, [#allocation19]  }
  0x59   : > { %s836_s27 = sshll.u32 %s4714_s18, 4  ;;  %s3992_s13 = smov [#allocation26]   ;;  %s837_s27 = int_to_ptr.hbm [resolvable:$true] %s836_s27 }
  0x5a   : > { %s862_s1 = sshll.u32 %s4715_s14, 4  ;;  %s864_s2 = sshll.u32 %s3992_s13, 4  ;;  %s863_s1 = int_to_ptr.hbm [resolvable:$true] %s862_s1  ;;  %s865_s2 = int_to_ptr.vmem [resolvable:$true] %s864_s2 }
  0x5b   : > { %3141 = dma.hbm_to_vmem [thread:$0]  (!%p4188_p6), %s837_s27, 16, %s839_s10, [#allocation22]  }
  0x5c   : > { %s896_s0 = sshll.u32 %s4716_s19, 4  ;;  %s930_s24 = sshll.u32 %s4658_s23, 4  ;;  %s897_s0 = int_to_ptr.hbm [resolvable:$true] %s896_s0  ;;  %s931_s24 = int_to_ptr.hbm [resolvable:$true] %s930_s24 }
  0x5d   : > { %3147 = dma.hbm_to_vmem [thread:$0]  (!%p4188_p6), %s863_s1, 16, %s865_s2, [#allocation25]  }
  0x5e   : > { %s3993_s18 = smov [#allocation29]   ;;  %s3994_s7 = smov [#allocation32]  }
  0x5f   : > { %s898_s27 = sshll.u32 %s3993_s18, 4  ;;  %s932_s12 = sshll.u32 %s3994_s7, 4  ;;  %s899_s27 = int_to_ptr.vmem [resolvable:$true] %s898_s27  ;;  %s933_s12 = int_to_ptr.vmem [resolvable:$true] %s932_s12 }
  0x60   : > { %3153 = dma.hbm_to_vmem [thread:$0]  (!%p4188_p6), %s897_s0, 1024, %s899_s27, [#allocation28], %s3979_s26, %s3979_s26, %s3980_s22  }
  0x61   : > { %3159 = dma.hbm_to_vmem [thread:$0]  (!%p4188_p6), %s931_s24, 1024, %s933_s12, [#allocation31], %s3979_s26, %s3979_s26, %s3980_s22  }
  0x62   : > { %s4669_s1 = sadd.s32 4294967294, %s3975_s30   ;;  %s4301_s20 = sadd.s32 1, %s3975_s30  }
  0x63   : > { %s63_s10 = ssub.s32 %s3975_s30, %s4301_s20  ;;  %s66_s13 = sadd.s32 1, %s3971_s9 }
  0x64   : > { %p64_p7 = scmp.eq.s32.totalorder %s63_s10, 0  ;;  %p73_p8 = scmp.ne.s32.totalorder %s3971_s9, %s3967_s5 }
  0x65   : > { %p74_p9 = scmp.eq.s32.totalorder %s3975_s30, 0  ;;  %p79_p10 = scmp.ne.s32.totalorder %s3967_s5, %s3963_s8 }
  0x66   : > { %s4312_s2 = scalar_select %p64_p7, %s3971_s9, %s66_s13  }
  0x67   : > { %p4314_p11 = por %p74_p9, %p73_p8  ;;  %p4320_p12 = por %p80_p1, %p79_p10 }
  0x68   : > { %p607_p13 = scmp.eq.s32.totalorder %s4171_s11, 1  ;;  %p613_p0 = scmp.eq.s32.totalorder %s4669_s1, 1 }
  0x69   : > { %p3193_p2 = scmp.lt.s32.totalorder %s3975_s30, 2  ;;  %s949_s26 = sand.u32 1, %s3971_s9  }
  0x6a   : > { %p4329_p4 = por %p607_p13, %p73_p8  ;;  %p4333_p6 = por %p613_p0, %p79_p10 }
  0x6b   : > { %s2699_s0 = sshll.u32 %s949_s26, 6  ;;  %s2974_s4 = sshll.u32 %s3975_s30, 6 }
  0x6c   : > { %s4721_s18 = sld [smem:[#allocation51_spill]]  ;;  %s953_s7 = scalar_lea.vmem [#allocation6], %s2699_s0 }
  0x6d   : > { %s961_s12 = sshll.u32 %s953_s7, 4  ;;  %p4343_p7 = pnand %p3193_p2, %p4314_p11  ;;  %s962_s12 = int_to_ptr.vmem [resolvable:$true] %s961_s12 }
  0x6e   : > { %s950_s1 = scalar_lea.sflag [#allocation7], %s949_s26 }
  0x6f   : > { %p3759_p9 = pneg %p4343_p7 }
  0x72   : > { %s958_s27 = scalar_lea.hbm %s4721_s18, %s2974_s4  ;;  %s3762_s25 = scalar_lea.hbm %s4721_s18, 128 }
  0x73   : > { %s959_s10 = sshll.u32 %s958_s27, 4  ;;  %s960_s10 = int_to_ptr.hbm [resolvable:$true] %s959_s10 }
  0x74   : > { %s3755_s14 = sshra.s32 %s960_s10, 4  ;;  %s3756_s14 = int_to_ptr.hbm [resolvable:$true] %s3755_s14 }
  0x75   : > { %s3757_s17 = scalar_lea.hbm %s3756_s14, 64  ;;  %p3763_p11 = scmp.lt.s32.totalorder %s3756_s14, %s4721_s18 }
  0x76   : > { %p3758_p8 = scmp.ne.s32.totalorder %s3756_s14, %s3757_s17  ;;  %p3764_p0 = scmp.lt.s32.totalorder %s3762_s25, %s3757_s17 }
  0x78   : > { %p3760_p10 = pnand %p3759_p9, %p3758_p8  ;;  %p3765_p2 = por %p3764_p0, %p3763_p11 }
  0x7a   : > { %p3761_p13 = pneg %p3760_p10 }
  0x7c   : > { %p3766_p5 = pnand %p3765_p2, %p3761_p13 }
  0x7e   : > { %3769 = shalt.err (!%p3766_p5)
}
  0x7f   : > { %s3995_s26 = smov 128   ;;  %s3996_s27 = smov 8  }
  0x80   : > { %3163 = dma.hbm_to_vmem [thread:$0]  (!%p4343_p7), %s960_s10, 1024, %s962_s12, %s950_s1, %s3995_s26, %s3995_s26, %s3996_s27  }
  0x81   : > { %973 = sbr.rel (%p4176_p3) target bundleno = 1467 (0x5bb), region = 120  ;;  %s4360_s7 = sand.u32 (!%p4176_p3), 1, %s3967_s5  }
  0x82   : > { %s2703_s0 = sshll.u32 (!%p4176_p3), %s4360_s7, 6  ;;  %s976_s14 = scalar_lea.sflag (!%p4176_p3), [#allocation7], %s4360_s7 }
  0x83   : > { %s4364_s17 = scalar_lea.vmem (!%p4176_p3), [#allocation6], %s2703_s0 }
  0x86   : > { %3914 = dma.done.wait (%p4320_p12), %s976_s14, 1024  }
  0x87   : > { %3916 = vsyncadd (%p4320_p12), %s976_s14, 4294966272 }
  0x88   : > { %3918 = dma.done.wait (%p80_p1), [#allocation10], 704  }
  0x89   : > { %3920 = vsyncadd (%p80_p1), [#allocation10], 4294966592 }
  0x8a   : > { %3922 = dma.done.wait (%p80_p1), [#allocation13], 1040  }
  0x8b   : > { %3924 = vsyncadd (%p80_p1), [#allocation13], 4294966256 }
  0x8c   : > { %3926 = dma.done.wait (%p80_p1), [#allocation16], 1040  }
  0x8d   : > { %3928 = vsyncadd (%p80_p1), [#allocation16], 4294966256 }
  0x8e   : > { %3930 = dma.done.wait (%p80_p1), [#allocation19], 208  }
  0x8f   : > { %3932 = vsyncadd (%p80_p1), [#allocation19], 4294967088 }
  0x90   : > { %3934 = dma.done.wait (%p80_p1), [#allocation22], 1040  }
  0x91   : > { %3936 = vsyncadd (%p80_p1), [#allocation22], 4294966256 }
  0x92   : > { %3938 = dma.done.wait (%p80_p1), [#allocation25], 1040  }
  0x93   : > { %3940 = vsyncadd (%p80_p1), [#allocation25], 4294966256 }
  0x94   : > { %3942 = dma.done.wait (%p80_p1), [#allocation28], 2048  }
  0x95   : > { %3944 = vsyncadd (%p80_p1), [#allocation28], 4294965248 }
  0x96   : > { %3946 = dma.done.wait (%p80_p1), [#allocation31], 1216  }
  0x97   : > { %3948 = vsyncadd (%p80_p1), [#allocation31], 4294966080  ;;  %v2978_v0 = vld [vmem:[#allocation9 + $0x18] sm:$0xff]  ;;  %v2977_v1 = vld [vmem:[#allocation9 + $0x10] sm:$0xff]  ;;  %v3997_v2 = vmov 0.0   ;;  %vm1195_vm0 = vcmask 523264  }
  0x98   : > { %1212 = vmatpush.bf16.msra.mxu0 %v2978_v0  ;;  %1253 = vst [vmem:[#allocation2] sm:$0xff] %v3997_v2  ;;  %v2976_v3 = vld [vmem:[#allocation9 + $0x8] sm:$0xff]  ;;  %v2975_v4 = vld [vmem:[#allocation9] sm:$0xff]  ;;  %v1149_v8 = vld [vmem:[%s4364_s17 + $0x10] sm:$0xff]  ;;  %s4723_s22 = sld [smem:[#allocation53_spill]]  ;;  %s2720_s4 = sshll.u32 %s4360_s7, 4 }
  0x99   : > { %1254 = vst [vmem:[#allocation2 + $0x8] sm:$0x3] %v3997_v2  ;;  %v1147_v5 = vld [vmem:[%s4364_s17] sm:$0xff]  ;;  %v1148_v6 = vld [vmem:[%s4364_s17 + $0x8] sm:$0xff]  ;;  %v1150_v9 = vld [vmem:[%s4364_s17 + $0x18] sm:$0xff]  ;;  %s4724_s13 = sld [smem:[#allocation55_spill]] }
  0x9a   : > { %1255 = vst [vmem:[#allocation2 + $0x10] sm:$0xff] %v3997_v2  ;;  %v1155_v7 = vpack.c.bf16 %v1148_v6, %v1147_v5  ;;  %v1156_v10 = vpack.c.bf16 %v1150_v9, %v1149_v8  ;;  %v1151_v11 = vld [vmem:[%s4364_s17 + $0x20] sm:$0xff]  ;;  %v1152_v12 = vld [vmem:[%s4364_s17 + $0x28] sm:$0xff]  ;;  %v1153_v14 = vld [vmem:[%s4364_s17 + $0x30] sm:$0xff]  ;;  %s4491_s25 = scalar_lea.vmem [#allocation33], %s2720_s4  ;;  %s2721_s24 = sshll.u32 %s4360_s7, 2 }
  0x9b   : > { %1256 = vst [vmem:[#allocation2 + $0x18] sm:$0x3] %v3997_v2  ;;  %v1157_v13 = vpack.c.bf16 %v1152_v12, %v1151_v11  ;;  %v1154_v15 = vld [vmem:[%s4364_s17 + $0x38] sm:$0xff]  ;;  %v1284_v25 = vld [vmem:[#allocation11] sm:$0x7]  ;;  %s4513_s6 = scalar_lea.vmem [#allocation34], %s2721_s24 }
  0x9c   : > { %1213 = vmatpush.bf16.msra.mxu0 %v2977_v1  ;;  %1257 = vst [vmem:[#allocation2 + $0x20] sm:$0xff] %v3997_v2  ;;  %v1158_v16 = vpack.c.bf16 %v1154_v15, %v1153_v14  ;;  %v1285_v26 = vld [vmem:[#allocation11 + $0x4] sm:$0x7]  ;;  %v4421_v29 = vperm.slane %v1284_v25, 0  ;;  %v1286_v32 = vld [vmem:[#allocation11 + $0x8] sm:$0x7] }
  0x9d   : > { %1258 = vst [vmem:[#allocation2 + $0x28] sm:$0x3] %v3997_v2  ;;  %v4423_v30 = vperm.slane %v1285_v26, 0  ;;  %v4428_v37 = vperm.slane %v1286_v32, 0  ;;  %v4430_v40 = vperm.slane %v1284_v25, 1  ;;  %v4432_v44 = vperm.slane %v1285_v26, 1 }
  0x9e   : > { %1259 = vst [vmem:[#allocation2 + $0x30] sm:$0xff] %v3997_v2  ;;  %v4417_v17 = vld [vmem:[%s4723_s22] ss:$0 sm:$0xff]  ;;  %v4436_v50 = vperm.slane %v1286_v32, 1  ;;  %v4440_v56 = vperm.slane %v1284_v25, 2  ;;  %v4442_v58 = vperm.slane %v1285_v26, 2 }
  0x9f   : > { %1260 = vst [vmem:[#allocation2 + $0x38] sm:$0x3] %v3997_v2  ;;  %v1287_v28 = vld [vmem:[#allocation2] ss:$2 sm:$0xf]  ;;  %v4446_v1 = vperm.slane %v1286_v32, 2 }
  0xa0   : > { %1214 = vmatpush.bf16.msra.mxu0 %v2976_v3  ;;  %1261 = vst [vmem:[#allocation2 + $0x40] sm:$0xff] %v3997_v2  ;;  %v1305_v35 = vmul.f32 %v4421_v29, %v1287_v28  ;;  %v1332_v39 = vld [vmem:[#allocation2 + $0x1] ss:$2 sm:$0xf]  ;;  %v4455_v12 = vld [vmem:[%s4724_s13] ss:$0 sm:$0xff] }
  0xa1   : > { %1262 = vst [vmem:[#allocation2 + $0x48] sm:$0x3] %v3997_v2  ;;  %v1350_v46 = vmul.f32 %v4430_v40, %v1332_v39  ;;  %v1377_v53 = vld [vmem:[#allocation2 + $0x2] ss:$2 sm:$0xf]  ;;  %s4725_s15 = sld [smem:[#allocation66_spill]] }
  0xa2   : > { %1263 = vst [vmem:[#allocation2 + $0x50] sm:$0xff] %v3997_v2  ;;  %v1395_v62 = vmul.f32 %v4440_v56, %v1377_v53  ;;  %s4726_s16 = sld [smem:[#allocation67_spill]]  ;;  %s4670_s4 = scalar_lea.vmem [#allocation36], %s4360_s7 }
  0xa3   : > { %1264 = vst [vmem:[#allocation2 + $0x58] sm:$0x3] %v3997_v2  ;;  %s4727_s13 = sld [smem:[#allocation69_spill]]  ;;  %s2323_s29 = sshll.u32 %s4491_s25, 4  ;;  %s4543_s29 = int_to_ptr.vmem [resolvable:$true] %s2323_s29 }
  0xa4   : > { %1215 = vmatpush.bf16.msra.mxu0 %v2975_v4  ;;  %1265 = vst [vmem:[#allocation2 + $0x60] sm:$0xff] %v3997_v2  ;;  %s4728_s27 = sld [smem:[#allocation71_spill]]  ;;  %s2340_s1 = sshll.u32 %s4513_s6, 4  ;;  %s2341_s1 = int_to_ptr.vmem [resolvable:$true] %s2340_s1 }
  0xa5   : > { %1266 = vst [vmem:[#allocation2 + $0x68] sm:$0x3] %v3997_v2  ;;  %s4729_s17 = sld [smem:[#allocation73_spill]]  ;;  %s2302_s22 = sand.u32 1, %s4171_s11  }
  0xa6   : > { %1267 = vst [vmem:[#allocation2 + $0x70] sm:$0xff] %v3997_v2  ;;  %s3036_s12 = sshll.u32 %s4171_s11, 2  ;;  %s4730_s24 = sld [smem:[#allocation76_spill]] }
  0xa7   : > { %2738 = vmatmul.msk.bf16.vlgmr.msra.gmra.mxu0 %vm1195_vm0, %v1155_v7  ;;  %1268 = vst [vmem:[#allocation2 + $0x78] sm:$0x3] %v3997_v2  ;;  %s4550_s0 = scalar_lea.sflag [#allocation35], %s2302_s22 }
  0xa8   : > { %1269 = vst [vmem:[#allocation2 + $0x80] sm:$0xff] %v3997_v2 }
  0xa9   : > { %1270 = vst [vmem:[#allocation2 + $0x88] sm:$0x3] %v3997_v2 }
  0xaa   : > { %1642 = vst [vmem:[#allocation3] sm:$0x3f] %v3997_v2 }
  0xab   : > { %1643 = vst [vmem:[#allocation3 + $0x8] sm:$0x3f] %v3997_v2 }
  0xac   : > { %1644 = vst [vmem:[#allocation3 + $0x10] sm:$0x3f] %v3997_v2  ;;  %s2339_s26 = scalar_lea.hbm %s4730_s24, %s3036_s12 }
  0xad   : > { %1645 = vst [vmem:[#allocation3 + $0x18] sm:$0x3f] %v3997_v2 }
  0xae   : > { %1646 = vst [vmem:[#allocation3 + $0x20] sm:$0x3f] %v3997_v2 }
  0xaf   : > { %1924 = vst [vmem:[#allocation4] sm:$0xf] %v3997_v2 }
  0xb0   : > { %1925 = vst [vmem:[#allocation4 + $0x4] sm:$0xf] %v3997_v2 }
  0xb1   : > { %1926 = vst [vmem:[#allocation4 + $0x8] sm:$0xf] %v3997_v2 }
  0xb2   : > { %2152 = vst [vmem:[#allocation5] sm:$0x7] %v3997_v2 }
  0xb3   : > { %2153 = vst [vmem:[#allocation5 + $0x4] sm:$0x7] %v3997_v2 }
  0xb4   : > { %2154 = vst [vmem:[#allocation5 + $0x8] sm:$0x7] %v3997_v2 }
  0xb7   : > { %2739 = vmatmul.msk.bf16.gmra.mxu0 %vm1195_vm0, %v1156_v10 }
  0xc7   : > { %2740 = vmatmul.msk.bf16.gmra.mxu0 %vm1195_vm0, %v1157_v13 }
  0xd7   : > { %2741 = vmatmul.msk.bf16.gmra.mxu0 %vm1195_vm0, %v1158_v16 }
 0x124   : > { %v1217_v18 = vpop.f32.mrf.mxu0 }
 0x125   : > { %v1218_v19 = vadd.f32 %v4417_v17, %v1217_v18 }
 0x127   : > { %v1237_v20 = vmax.f32 %v1218_v19, 0.0 }
 0x129   : > { %v1245_v21 = vmin.f32 %v1237_v20, 6.0  ;;  %v2986_v20 = vld [vmem:[#allocation12 + $0x38] sm:$0xff] }
 0x12a   : > { %1521 = vmatpush.bf16.msra.mxu1 %v2986_v20 }
 0x12b   : > { %1276 = vst [vmem:[#allocation2 + $0x11] sm:$0xff] %v1245_v21 }
 0x12c   : > { %v1219_v22 = vpop.f32.mrf.mxu0 }
 0x12d   : > { %v1220_v23 = vadd.f32 %v4417_v17, %v1219_v22 }
 0x12f   : > { %v1238_v24 = vmax.f32 %v1220_v23, 0.0 }
 0x131   : > { %v1246_v27 = vmin.f32 %v1238_v24, 6.0 }
 0x132   : > { %v1289_v31 = vld [vmem:[#allocation2 + $0x10] ss:$2 sm:$0xf]  ;;  %v1334_v47 = vld [vmem:[#allocation2 + $0x11] ss:$2 sm:$0xf] }
 0x133   : > { %1277 = vst [vmem:[#allocation2 + $0x21] sm:$0xff] %v1246_v27  ;;  %v1314_v36 = vmul.f32 %v4423_v30, %v1289_v31  ;;  %v1359_v54 = vmul.f32 %v4432_v44, %v1334_v47  ;;  %v1379_v63 = vld [vmem:[#allocation2 + $0x12] ss:$2 sm:$0xf] }
 0x134   : > { %v1222_v33 = vpop.f32.mrf.mxu0  ;;  %v1404_v5 = vmul.f32 %v4442_v58, %v1379_v63 }
 0x135   : > { %v1223_v34 = vadd.f32 %v4417_v17, %v1222_v33  ;;  %v1318_v43 = vadd.f32 %v1314_v36, %v1305_v35 }
 0x137   : > { %v1239_v38 = vmax.f32 %v1223_v34, 0.0  ;;  %v2985_v34 = vld [vmem:[#allocation12 + $0x30] sm:$0xff] }
 0x138   : > { %1522 = vmatpush.bf16.msra.mxu1 %v2985_v34 }
 0x139   : > { %v1247_v41 = vmin.f32 %v1239_v38, 6.0 }
 0x13a   : > { %v1291_v42 = vld [vmem:[#allocation2 + $0x20] ss:$2 sm:$0xf]  ;;  %v1336_v52 = vld [vmem:[#allocation2 + $0x21] ss:$2 sm:$0xf] }
 0x13b   : > { %v1323_v45 = vmul.f32 %v4428_v37, %v1291_v42  ;;  %1278 = vst [vmem:[#allocation2 + $0x31] sm:$0xff] %v1247_v41  ;;  %v1368_v60 = vmul.f32 %v4436_v50, %v1336_v52  ;;  %v1381_v2 = vld [vmem:[#allocation2 + $0x22] ss:$2 sm:$0xf]  ;;  %v1306_v13 = vmul.f32 %v4421_v29, %v1291_v42  ;;  %v1351_v24 = vmul.f32 %v4430_v40, %v1336_v52  ;;  %v2983_v52 = vld [vmem:[#allocation12 + $0x20] sm:$0xff] }
 0x13c   : > { %v1224_v48 = vpop.f32.mrf.mxu0  ;;  %v1413_v8 = vmul.f32 %v4446_v1, %v1381_v2  ;;  %v1396_v42 = vmul.f32 %v4440_v56, %v1381_v2 }
 0x13d   : > { %v1327_v49 = vadd.f32 %v1323_v45, %v1318_v43  ;;  %v1225_v51 = vadd.f32 %v4417_v17, %v1224_v48 }
 0x13f   : > { %v1354_v55 = vadd.f32 %v1350_v46, %v1327_v49  ;;  %v1240_v57 = vmax.f32 %v1225_v51, 0.0  ;;  %v2984_v46 = vld [vmem:[#allocation12 + $0x28] sm:$0xff] }
 0x140   : > { %1523 = vmatpush.bf16.msra.mxu1 %v2984_v46 }
 0x141   : > { %v1363_v59 = vadd.f32 %v1359_v54, %v1354_v55  ;;  %v1248_v61 = vmin.f32 %v1240_v57, 6.0 }
 0x142   : > { %v1293_v3 = vld [vmem:[#allocation2 + $0x30] ss:$2 sm:$0xf]  ;;  %v1338_v21 = vld [vmem:[#allocation2 + $0x31] ss:$2 sm:$0xf] }
 0x143   : > { %v1372_v0 = vadd.f32 %v1368_v60, %v1363_v59  ;;  %1279 = vst [vmem:[#allocation2 + $0x41] sm:$0xff] %v1248_v61  ;;  %v1315_v9 = vmul.f32 %v4423_v30, %v1293_v3  ;;  %v1360_v31 = vmul.f32 %v4432_v44, %v1338_v21  ;;  %v1383_v41 = vld [vmem:[#allocation2 + $0x32] ss:$2 sm:$0xf] }
 0x144   : > { %v1227_v4 = vpop.f32.mrf.mxu0  ;;  %v1405_v49 = vmul.f32 %v4442_v58, %v1383_v41  ;;  %1524 = vmatpush.bf16.msra.mxu1 %v2983_v52 }
 0x145   : > { %v1228_v6 = vadd.f32 %v4417_v17, %v1227_v4  ;;  %v1399_v7 = vadd.f32 %v1395_v62, %v1372_v0  ;;  %v1319_v18 = vadd.f32 %v1315_v9, %v1306_v13  ;;  %v2982_v62 = vld [vmem:[#allocation12 + $0x18] sm:$0xff] }
 0x147   : > { %v1241_v10 = vmax.f32 %v1228_v6, 0.0  ;;  %v1408_v11 = vadd.f32 %v1404_v5, %v1399_v7 }
 0x148   : > { %1525 = vmatpush.bf16.msra.mxu1 %v2982_v62  ;;  %v2991_v62 = vld [vmem:[#allocation15 + $0x20] sm:$0xff] }
 0x149   : > { %v1249_v14 = vmin.f32 %v1241_v10, 6.0  ;;  %v1417_v15 = vadd.f32 %v1413_v8, %v1408_v11  ;;  %v2981_v10 = vld [vmem:[#allocation12 + $0x10] sm:$0xff] }
 0x14a   : > { %v1295_v16 = vld [vmem:[#allocation2 + $0x40] ss:$2 sm:$0xf]  ;;  %v1340_v27 = vld [vmem:[#allocation2 + $0x41] ss:$2 sm:$0xf] }
 0x14b   : > { %v1324_v19 = vmul.f32 %v4428_v37, %v1295_v16  ;;  %1280 = vst [vmem:[#allocation2 + $0x51] sm:$0xff] %v1249_v14  ;;  %v1425_v23 = vadd.f32 %v4455_v12, %v1417_v15  ;;  %v1369_v38 = vmul.f32 %v4436_v50, %v1340_v27  ;;  %v1385_v45 = vld [vmem:[#allocation2 + $0x42] ss:$2 sm:$0xf]  ;;  %v1307_v60 = vmul.f32 %v4421_v29, %v1295_v16 }
 0x14c   : > { %v1229_v22 = vpop.f32.mrf.mxu0  ;;  %v1414_v54 = vmul.f32 %v4446_v1, %v1385_v45  ;;  %v1352_v7 = vmul.f32 %v4430_v40, %v1340_v27  ;;  %1526 = vmatpush.bf16.msra.mxu1 %v2981_v10 }
 0x14d   : > { %v1328_v25 = vadd.f32 %v1324_v19, %v1319_v18  ;;  %v1230_v26 = vadd.f32 %v4417_v17, %v1229_v22  ;;  %v1429_v28 = vmax.f32 %v1425_v23, 0.0  ;;  %v2980_v22 = vld [vmem:[#allocation12 + $0x8] sm:$0xff] }
 0x14f   : > { %v1355_v32 = vadd.f32 %v1351_v24, %v1328_v25  ;;  %v1242_v33 = vmax.f32 %v1230_v26, 0.0  ;;  %v1433_v35 = vmin.f32 %v1429_v28, 6.0  ;;  %v1397_v24 = vmul.f32 %v4440_v56, %v1385_v45  ;;  %v2979_v28 = vld [vmem:[#allocation12] sm:$0xff] }
 0x150   : > { %1527 = vmatpush.bf16.msra.mxu1 %v2980_v22  ;;  %v2994_v45 = vld [vmem:[#allocation15 + $0x38] sm:$0xff]  ;;  %v3271_v22 = vld [vmem:[#allocation17] ss:$0 sm:$0xff] }
 0x151   : > { %v1364_v36 = vadd.f32 %v1360_v31, %v1355_v32  ;;  %v1250_v39 = vmin.f32 %v1242_v33, 6.0  ;;  %1441 = vst [vmem:[#allocation1] ss:$2 sm:$0xff] %v1433_v35  ;;  %1618 = vmatpush.bf16.msra.mxu2 %v2994_v45 }
 0x152   : > { %v1297_v47 = vld [vmem:[#allocation2 + $0x50] ss:$2 sm:$0xf]  ;;  %v1342_v4 = vld [vmem:[#allocation2 + $0x51] ss:$2 sm:$0xf] }
 0x153   : > { %v1373_v43 = vadd.f32 %v1369_v38, %v1364_v36  ;;  %1281 = vst [vmem:[#allocation2 + $0x61] sm:$0xff] %v1250_v39  ;;  %v1316_v55 = vmul.f32 %v4423_v30, %v1297_v47  ;;  %v1361_v14 = vmul.f32 %v4432_v44, %v1342_v4  ;;  %v1387_v23 = vld [vmem:[#allocation2 + $0x52] ss:$2 sm:$0xf] }
 0x154   : > { %v1232_v48 = vpop.f32.mrf.mxu0  ;;  %v1406_v27 = vmul.f32 %v4442_v58, %v1387_v23  ;;  %1528 = vmatpush.bf16.msra.mxu1 %v2979_v28  ;;  %v3001_v23 = vld [vmem:[#allocation21 + $0x30] sm:$0xff] }
 0x155   : > { %v1233_v51 = vadd.f32 %v4417_v17, %v1232_v48  ;;  %v1400_v53 = vadd.f32 %v1396_v42, %v1373_v43  ;;  %v1320_v2 = vadd.f32 %v1316_v55, %v1307_v60  ;;  %v2992_v55 = vld [vmem:[#allocation15 + $0x28] sm:$0xff]  ;;  %v4497_v28 = vld [vmem:[#allocation18] sm:$0x7] }
 0x157   : > { %v1243_v57 = vmax.f32 %v1233_v51, 0.0  ;;  %v1409_v59 = vadd.f32 %v1405_v49, %v1400_v53 }
 0x159   : > { %v1251_v61 = vmin.f32 %v1243_v57, 6.0  ;;  %v1418_v63 = vadd.f32 %v1414_v54, %v1409_v59 }
 0x15a   : > { %v1299_v0 = vld [vmem:[#allocation2 + $0x60] ss:$2 sm:$0xf]  ;;  %v1344_v11 = vld [vmem:[#allocation2 + $0x61] ss:$2 sm:$0xf] }
 0x15b   : > { %v1325_v3 = vmul.f32 %v4428_v37, %v1299_v0  ;;  %1282 = vst [vmem:[#allocation2 + $0x71] sm:$0xff] %v1251_v61  ;;  %v1426_v6 = vadd.f32 %v4455_v12, %v1418_v63  ;;  %v1370_v20 = vmul.f32 %v4436_v50, %v1344_v11  ;;  %v1308_v35 = vmul.f32 %v4421_v29, %v1299_v0 }
 0x15c   : > { %v1234_v5 = vpop.f32.mrf.mxu0  ;;  %v1353_v46 = vmul.f32 %v4430_v40, %v1344_v11 }
 0x15d   : > { %v1329_v8 = vadd.f32 %v1325_v3, %v1320_v2  ;;  %v1235_v9 = vadd.f32 %v4417_v17, %v1234_v5  ;;  %v1430_v13 = vmax.f32 %v1426_v6, 0.0  ;;  %v1389_v17 = vld [vmem:[#allocation2 + $0x62] ss:$2 sm:$0xf]  ;;  %v2990_v6 = vld [vmem:[#allocation15 + $0x18] sm:$0xff] }
 0x15e   : > { %v1415_v32 = vmul.f32 %v4446_v1, %v1389_v17  ;;  %v1398_v57 = vmul.f32 %v4440_v56, %v1389_v17 }
 0x15f   : > { %v1356_v15 = vadd.f32 %v1352_v7, %v1329_v8  ;;  %v1244_v16 = vmax.f32 %v1235_v9, 0.0  ;;  %v1434_v18 = vmin.f32 %v1430_v13, 6.0  ;;  %v2988_v7 = vld [vmem:[#allocation15 + $0x8] sm:$0xff]  ;;  %v3270_v8 = vld [vmem:[#allocation14] ss:$0 sm:$0xff] }
 0x161   : > { %v1365_v19 = vadd.f32 %v1361_v14, %v1356_v15  ;;  %v1252_v21 = vmin.f32 %v1244_v16, 6.0  ;;  %1443 = vst [vmem:[#allocation1 + $0x1] ss:$2 sm:$0xff] %v1434_v18 }
 0x162   : > { %v1301_v26 = vld [vmem:[#allocation2 + $0x70] ss:$2 sm:$0xf]  ;;  %v1346_v43 = vld [vmem:[#allocation2 + $0x71] ss:$2 sm:$0xf] }
 0x163   : > { %v1374_v25 = vadd.f32 %v1370_v20, %v1365_v19  ;;  %1283 = vst [vmem:[#allocation2 + $0x81] sm:$0xff] %v1252_v21  ;;  %v1317_v33 = vmul.f32 %v4423_v30, %v1301_v26  ;;  %v2993_v30 = vld [vmem:[#allocation15 + $0x30] sm:$0xff]  ;;  %v1362_v51 = vmul.f32 %v4432_v44, %v1346_v43  ;;  %v3002_v21 = vld [vmem:[#allocation21 + $0x38] sm:$0xff]  ;;  %v3000_v26 = vld [vmem:[#allocation21 + $0x28] sm:$0xff] }
 0x164   : > { %1619 = vmatpush.bf16.msra.mxu2 %v2993_v30  ;;  %1817 = vmatpush.bf16.msra.mxu3 %v3002_v21  ;;  %v2998_v43 = vld [vmem:[#allocation21 + $0x18] sm:$0xff] }
 0x165   : > { %v1401_v31 = vadd.f32 %v1397_v24, %v1374_v25  ;;  %v1321_v39 = vadd.f32 %v1317_v33, %v1308_v35  ;;  %v4499_v33 = vld [vmem:[#allocation18 + $0x4] sm:$0x7]  ;;  %v1666_v35 = vperm.slane %v4497_v28, 0 }
 0x166   : > { %v3009_v21 = vld [vmem:[#allocation24 + $0x30] sm:$0xff] }
 0x167   : > { %v1410_v34 = vadd.f32 %v1406_v27, %v1401_v31 }
 0x168   : > { %1620 = vmatpush.bf16.msra.mxu2 %v2992_v55  ;;  %v1448_v4 = vld.sshfl [vmem:[#allocation1] sm:$0xff pattern:$0x75316420]  ;;  %1818 = vmatpush.bf16.msra.mxu3 %v3001_v23  ;;  %v1696_v55 = vperm.slane %v4499_v33, 1 }
 0x169   : > { %v1419_v36 = vadd.f32 %v1415_v32, %v1410_v34  ;;  %v2999_v32 = vld [vmem:[#allocation21 + $0x20] sm:$0xff] }
 0x16a   : > { %v1303_v38 = vld [vmem:[#allocation2 + $0x80] ss:$2 sm:$0xf]  ;;  %v1348_v49 = vld [vmem:[#allocation2 + $0x81] ss:$2 sm:$0xf] }
 0x16b   : > { %v1326_v41 = vmul.f32 %v4428_v37, %v1303_v38  ;;  %v1427_v42 = vadd.f32 %v4455_v12, %v1419_v36  ;;  %v1371_v54 = vmul.f32 %v4436_v50, %v1348_v49  ;;  %v1391_v37 = vld [vmem:[#allocation2 + $0x72] ss:$2 sm:$0xf]  ;;  %v1393_v40 = vld [vmem:[#allocation2 + $0x82] ss:$2 sm:$0xf] }
 0x16c   : > { %v1407_v60 = vmul.f32 %v4442_v58, %v1391_v37  ;;  %v1416_v44 = vmul.f32 %v4446_v1, %v1393_v40  ;;  %1621 = vmatpush.bf16.msra.mxu2 %v2991_v62  ;;  %v2989_v58 = vld [vmem:[#allocation15 + $0x10] sm:$0xff]  ;;  %v2987_v1 = vld [vmem:[#allocation15] sm:$0xff]  ;;  %1819 = vmatpush.bf16.msra.mxu3 %v3000_v26  ;;  %v4502_v38 = vld [vmem:[#allocation18 + $0x8] sm:$0x7] }
 0x16d   : > { %v1330_v47 = vadd.f32 %v1326_v41, %v1321_v39  ;;  %v1431_v48 = vmax.f32 %v1427_v42, 0.0  ;;  %v1657_v39 = vld [vmem:[#allocation3] ss:$2 sm:$0x3]  ;;  %v1671_v41 = vperm.slane %v4499_v33, 0 }
 0x16e   : > { %v1667_v45 = vmul.f32 %v1666_v35, %v1657_v39  ;;  %v1682_v49 = vld [vmem:[#allocation3 + $0x1] ss:$2 sm:$0x3] }
 0x16f   : > { %v1357_v29 = vadd.f32 %v1353_v46, %v1330_v47  ;;  %v1435_v52 = vmin.f32 %v1431_v48, 6.0  ;;  %v1676_v46 = vperm.slane %v4502_v38, 0  ;;  %v2996_v62 = vld [vmem:[#allocation21 + $0x8] sm:$0xff] }
 0x170   : > { %1622 = vmatpush.bf16.msra.mxu2 %v2990_v6  ;;  %1820 = vmatpush.bf16.msra.mxu3 %v2999_v32  ;;  %v3008_v32 = vld [vmem:[#allocation24 + $0x28] sm:$0xff] }
 0x171   : > { %v1366_v53 = vadd.f32 %v1362_v51, %v1357_v29  ;;  %1445 = vst [vmem:[#allocation1 + $0x10] ss:$2 sm:$0xff] %v1435_v52  ;;  %v1691_v51 = vperm.slane %v4497_v28, 1 }
 0x173   : > { %v1375_v59 = vadd.f32 %v1371_v54, %v1366_v53  ;;  %v1692_v37 = vmul.f32 %v1691_v51, %v1682_v49  ;;  %v3006_v49 = vld [vmem:[#allocation24 + $0x18] sm:$0xff] }
 0x174   : > { %1623 = vmatpush.bf16.msra.mxu2 %v2989_v58  ;;  %1821 = vmatpush.bf16.msra.mxu3 %v2998_v43  ;;  %v3007_v43 = vld [vmem:[#allocation24 + $0x20] sm:$0xff] }
 0x175   : > { %v1402_v61 = vadd.f32 %v1398_v57, %v1375_v59  ;;  %v2997_v57 = vld [vmem:[#allocation21 + $0x10] sm:$0xff] }
 0x177   : > { %v1411_v63 = vadd.f32 %v1407_v60, %v1402_v61  ;;  %v1701_v60 = vperm.slane %v4502_v38, 1  ;;  %v1707_v61 = vld [vmem:[#allocation3 + $0x2] ss:$2 sm:$0x3] }
 0x178   : > { %1624 = vmatpush.bf16.msra.mxu2 %v2988_v7  ;;  %1822 = vmatpush.bf16.msra.mxu3 %v2997_v57  ;;  %v3273_v57 = vld [vmem:[#allocation23] ss:$0 sm:$0xff] }
 0x179   : > { %v1420_v0 = vadd.f32 %v1416_v44, %v1411_v63  ;;  %v1716_v63 = vperm.slane %v4497_v28, 2 }
 0x17b   : > { %v1428_v50 = vadd.f32 %v4455_v12, %v1420_v0 }
 0x17c   : > { %1625 = vmatpush.bf16.msra.mxu2 %v2987_v1  ;;  %1823 = vmatpush.bf16.msra.mxu3 %v2996_v62  ;;  %v2995_v1 = vld [vmem:[#allocation21] sm:$0xff] }
 0x17d   : > { %v1432_v2 = vmax.f32 %v1428_v50, 0.0 }
 0x17f   : > { %v1436_v3 = vmin.f32 %v1432_v2, 6.0  ;;  %v1717_v2 = vmul.f32 %v1716_v63, %v1707_v61 }
 0x180   : > { %1824 = vmatpush.bf16.msra.mxu3 %v2995_v1  ;;  %v1935_v1 = vld [vmem:[#allocation4] ss:$2 sm:$0x1] }
 0x181   : > { %1447 = vst [vmem:[#allocation1 + $0x11] ss:$2 sm:$0xff] %v1436_v3  ;;  %v1721_v3 = vperm.slane %v4499_v33, 2 }
 0x188   : > { %v1449_v56 = vld.sshfl [vmem:[#allocation1 + $0x10] sm:$0xff pattern:$0x75316420] }
 0x189   : > { %v1452_v5 = vpack.c.bf16 %v1449_v56, %v1448_v4 }
 0x18b   : > { %1529 = vmatmul.bf16.vlgmr.msra.gmra.mxu1 %v1452_v5 }
 0x208   : > { %v1530_v9 = vpop.f32.mrf.mxu1 }
 0x209   : > { %v1531_v12 = vadd.f32 %v3270_v8, %v1530_v9 }
 0x20b   : > { %v1535_v10 = vmax.f32 %v1531_v12, 0.0  ;;  %v1726_v12 = vperm.slane %v4502_v38, 2 }
 0x20d   : > { %v1537_v11 = vmin.f32 %v1535_v10, 6.0 }
 0x20f   : > { %v1541_v13 = vrot.slane %v1537_v11, 4  ;;  %1545 = vst [vmem:[%s4491_s25] sm:$0xf] %v1537_v11 }
 0x210   : > { %v1532_v14 = vpop.f32.mrf.mxu1 }
 0x211   : > { %1546 = vst [vmem:[%s4491_s25 + $0x4] sm:$0xf] %v1541_v13  ;;  %v1533_v15 = vadd.f32 %v3270_v8, %v1532_v14  ;;  %v3010_v13 = vld [vmem:[#allocation24 + $0x38] sm:$0xff] }
 0x212   : > { %1906 = vmatpush.bf16.msrb.mxu1 %v3010_v13 }
 0x213   : > { %v1536_v16 = vmax.f32 %v1533_v15, 0.0 }
 0x215   : > { %v1538_v18 = vmin.f32 %v1536_v16, 6.0 }
 0x216   : > { %1907 = vmatpush.bf16.msrb.mxu1 %v3009_v21 }
 0x217   : > { %v1542_v19 = vrot.slane %v1538_v18, 4  ;;  %1547 = vst [vmem:[%s4491_s25 + $0x8] sm:$0xf] %v1538_v18  ;;  %v1549_v20 = vpack.c.bf16 %v1538_v18, %v1537_v11 }
 0x219   : > { %1548 = vst [vmem:[%s4491_s25 + $0xc] sm:$0xf] %v1542_v19  ;;  %1626 = vmatmul.bf16.vlgmr.msra.gmra.mxu2 %v1549_v20 }
 0x21a   : > { %1908 = vmatpush.bf16.msrb.mxu1 %v3008_v32 }
 0x21e   : > { %1909 = vmatpush.bf16.msrb.mxu1 %v3007_v43 }
 0x222   : > { %1910 = vmatpush.bf16.msrb.mxu1 %v3006_v49 }
 0x29c   : > { %v1627_v24 = vpop.f32.mrf.mxu2 }
 0x29d   : > { %v1628_v25 = vadd.f32 %v3271_v22, %v1627_v24 }
 0x29f   : > { %v1632_v17 = vmax.f32 %v1628_v25, 0.0  ;;  %v3272_v25 = vld [vmem:[#allocation20] ss:$0 sm:$0xff] }
 0x2a1   : > { %v1634_v27 = vmin.f32 %v1632_v17, 6.0 }
 0x2a3   : > { %v1638_v31 = vrot.slane %v1634_v27, 4  ;;  %1650 = vst [vmem:[#allocation3 + $0x9] sm:$0xf] %v1634_v27 }
 0x2a4   : > { %v1629_v34 = vpop.f32.mrf.mxu2 }
 0x2a5   : > { %1651 = vst [vmem:[#allocation3 + $0x11] sm:$0xf] %v1638_v31  ;;  %v1630_v36 = vadd.f32 %v3271_v22, %v1629_v34 }
 0x2a7   : > { %v1633_v42 = vmax.f32 %v1630_v36, 0.0 }
 0x2a9   : > { %v1635_v47 = vmin.f32 %v1633_v42, 6.0 }
 0x2aa   : > { %v1659_v48 = vld [vmem:[#allocation3 + $0x8] ss:$2 sm:$0x3]  ;;  %v1684_v59 = vld [vmem:[#allocation3 + $0x9] ss:$2 sm:$0x3] }
 0x2ab   : > { %v1672_v30 = vmul.f32 %v1671_v41, %v1659_v48  ;;  %v1639_v29 = vrot.slane %v1635_v47, 4  ;;  %1652 = vst [vmem:[#allocation3 + $0x19] sm:$0xf] %v1635_v47  ;;  %v1697_v50 = vmul.f32 %v1696_v55, %v1684_v59  ;;  %v1709_v58 = vld [vmem:[#allocation3 + $0xa] ss:$2 sm:$0x3] }
 0x2ac   : > { %v1661_v52 = vld [vmem:[#allocation3 + $0x10] ss:$2 sm:$0x3]  ;;  %v1686_v44 = vld [vmem:[#allocation3 + $0x11] ss:$2 sm:$0x3]  ;;  %v1722_v15 = vmul.f32 %v1721_v3, %v1709_v58 }
 0x2ad   : > { %v1674_v53 = vadd.f32 %v1672_v30, %v1667_v45  ;;  %v1677_v54 = vmul.f32 %v1676_v46, %v1661_v52  ;;  %1653 = vst [vmem:[#allocation3 + $0x21] sm:$0xf] %v1639_v29  ;;  %v1668_v56 = vmul.f32 %v1666_v35, %v1661_v52  ;;  %v1702_v6 = vmul.f32 %v1701_v60, %v1686_v44  ;;  %v1711_v14 = vld [vmem:[#allocation3 + $0x12] ss:$2 sm:$0x3] }
 0x2ae   : > { %v1693_v18 = vmul.f32 %v1691_v51, %v1686_v44  ;;  %v1727_v24 = vmul.f32 %v1726_v12, %v1711_v14  ;;  %v1718_v34 = vmul.f32 %v1716_v63, %v1711_v14  ;;  %v3005_v29 = vld [vmem:[#allocation24 + $0x10] sm:$0xff]  ;;  %v1932_v58 = vld [vmem:[%s4725_s15] sm:$0x7] }
 0x2af   : > { %v1679_v40 = vadd.f32 %v1677_v54, %v1674_v53  ;;  %1911 = vmatpush.bf16.msrb.mxu1 %v3005_v29  ;;  %v1934_v14 = vld [vmem:[%s4725_s15 + $0x8] sm:$0x7] }
 0x2b1   : > { %v1694_v0 = vadd.f32 %v1692_v37, %v1679_v40  ;;  %v3004_v37 = vld [vmem:[#allocation24 + $0x8] sm:$0xff] }
 0x2b2   : > { %v1663_v4 = vld [vmem:[#allocation3 + $0x18] ss:$2 sm:$0x3]  ;;  %v1688_v16 = vld [vmem:[#allocation3 + $0x19] ss:$2 sm:$0x3] }
 0x2b3   : > { %v1699_v5 = vadd.f32 %v1697_v50, %v1694_v0  ;;  %v1673_v7 = vmul.f32 %v1671_v41, %v1663_v4  ;;  %v1698_v26 = vmul.f32 %v1696_v55, %v1688_v16  ;;  %v1713_v33 = vld [vmem:[#allocation3 + $0x1a] ss:$2 sm:$0x3]  ;;  %1912 = vmatpush.bf16.msrb.mxu1 %v3004_v37  ;;  %v3017_v50 = vld [vmem:[#allocation27 + $0x30] sm:$0xff] }
 0x2b4   : > { %v1665_v8 = vld [vmem:[#allocation3 + $0x20] ss:$2 sm:$0x3]  ;;  %v1690_v22 = vld [vmem:[#allocation3 + $0x21] ss:$2 sm:$0x3]  ;;  %v1723_v42 = vmul.f32 %v1721_v3, %v1713_v33 }
 0x2b5   : > { %v1704_v9 = vadd.f32 %v1702_v6, %v1699_v5  ;;  %v1675_v10 = vadd.f32 %v1673_v7, %v1668_v56  ;;  %v1678_v11 = vmul.f32 %v1676_v46, %v1665_v8  ;;  %v1703_v31 = vmul.f32 %v1701_v60, %v1690_v22  ;;  %v1715_v38 = vld [vmem:[#allocation3 + $0x22] ss:$2 sm:$0x3]  ;;  %v3018_v0 = vld [vmem:[#allocation27 + $0x38] sm:$0xff]  ;;  %v3013_v56 = vld [vmem:[#allocation27 + $0x10] sm:$0xff] }
 0x2b6   : > { %v1728_v47 = vmul.f32 %v1726_v12, %v1715_v38  ;;  %v3003_v55 = vld [vmem:[#allocation24] sm:$0xff]  ;;  %2055 = vmatpush.bf16.msrb.mxu2 %v3018_v0  ;;  %v3012_v5 = vld [vmem:[#allocation27 + $0x8] sm:$0xff]  ;;  %v1953_v22 = vrot.slane %v1932_v58, 1  ;;  %v1963_v33 = vrot.slane %v1934_v14, 1 }
 0x2b7   : > { %v1719_v19 = vadd.f32 %v1717_v2, %v1704_v9  ;;  %v1680_v20 = vadd.f32 %v1678_v11, %v1675_v10  ;;  %1913 = vmatpush.bf16.msrb.mxu1 %v3003_v55  ;;  %v3016_v2 = vld [vmem:[#allocation27 + $0x28] sm:$0xff]  ;;  %v3015_v3 = vld [vmem:[#allocation27 + $0x20] sm:$0xff]  ;;  %v3014_v4 = vld [vmem:[#allocation27 + $0x18] sm:$0xff]  ;;  %v1940_v11 = vmul.f32 %v1935_v1, %v1932_v58 }
 0x2b8   : > { %v3274_v6 = vld [vmem:[#allocation26] ss:$0 sm:$0xff]  ;;  %v1933_v7 = vld [vmem:[%s4725_s15 + $0x4] sm:$0x7]  ;;  %v3011_v9 = vld [vmem:[#allocation27] sm:$0xff] }
 0x2b9   : > { %v1724_v23 = vadd.f32 %v1722_v15, %v1719_v19  ;;  %v1695_v17 = vadd.f32 %v1693_v18, %v1680_v20  ;;  %v1937_v8 = vld [vmem:[#allocation4 + $0x4] ss:$2 sm:$0x1]  ;;  %v1939_v15 = vld [vmem:[#allocation4 + $0x8] ss:$2 sm:$0x1] }
 0x2ba   : > { %2056 = vmatpush.bf16.msrb.mxu2 %v3017_v50  ;;  %v1942_v13 = vmul.f32 %v1937_v8, %v1933_v7  ;;  %v3026_v18 = vld [vmem:[#allocation29 + $0x38] sm:$0xff]  ;;  %v1944_v21 = vmul.f32 %v1939_v15, %v1934_v14  ;;  %v1985_v55 = vld [vmem:[%s4726_s16] sm:$0x1]  ;;  %v2163_v15 = vld [vmem:[#allocation5 + $0x4] ss:$2 sm:$0x1] }
 0x2bb   : > { %v1729_v27 = vadd.f32 %v1727_v24, %v1724_v23  ;;  %v1700_v28 = vadd.f32 %v1698_v26, %v1695_v17  ;;  %2137 = vmatpush.bf16.msrb.mxu3 %v3026_v18  ;;  %v3025_v23 = vld [vmem:[#allocation29 + $0x30] sm:$0xff]  ;;  %v1947_v24 = vld [vmem:[#allocation4 + $0x1] ss:$2 sm:$0x1]  ;;  %v3033_v0 = vld [vmem:[#allocation32 + $0x30] sm:$0xff] }
 0x2bc   : > { %v1943_v20 = vadd.f32 %v1942_v13, %v1940_v11  ;;  %v1968_v38 = vld [vmem:[#allocation4 + $0x2] ss:$2 sm:$0x1]  ;;  %v3032_v50 = vld [vmem:[#allocation32 + $0x28] sm:$0xff]  ;;  %v3030_v1 = vld [vmem:[#allocation32 + $0x18] sm:$0xff] }
 0x2bd   : > { %v1735_v35 = vadd.f32 %v3272_v25, %v1729_v27  ;;  %v1705_v36 = vadd.f32 %v1703_v31, %v1700_v28  ;;  %v1955_v27 = vmul.f32 %v1953_v22, %v1947_v24  ;;  %v3024_v28 = vld [vmem:[#allocation29 + $0x28] sm:$0xff]  ;;  %v1958_v31 = vrot.slane %v1933_v7, 1  ;;  %v3029_v8 = vld [vmem:[#allocation32 + $0x10] sm:$0xff]  ;;  %v2159_v13 = vld [vmem:[#allocation30 + $0x4] sm:$0x7] }
 0x2be   : > { %2057 = vmatpush.bf16.msrb.mxu2 %v3016_v2  ;;  %v1945_v26 = vadd.f32 %v1944_v21, %v1943_v20  ;;  %v3031_v2 = vld [vmem:[#allocation32 + $0x20] sm:$0xff]  ;;  %v2158_v11 = vld [vmem:[#allocation30] sm:$0x7]  ;;  %v2168_v20 = vmul.f32 %v2163_v15, %v2159_v13  ;;  %v2160_v21 = vld [vmem:[#allocation30 + $0x8] sm:$0x7] }
 0x2bf   : > { %v1737_v39 = vmax.f32 %v1735_v35, 0.0  ;;  %v1720_v41 = vadd.f32 %v1718_v34, %v1705_v36  ;;  %2138 = vmatpush.bf16.msrb.mxu3 %v3025_v23  ;;  %v1973_v34 = vrot.slane %v1932_v58, 2  ;;  %v3023_v35 = vld [vmem:[#allocation29 + $0x20] sm:$0xff]  ;;  %v2165_v22 = vld [vmem:[#allocation5 + $0x8] ss:$2 sm:$0x1] }
 0x2c0   : > { %v1956_v32 = vadd.f32 %v1955_v27, %v1945_v26  ;;  %v2179_v26 = vrot.slane %v2158_v11, 1  ;;  %v2173_v27 = vld [vmem:[#allocation5 + $0x1] ss:$2 sm:$0x1] }
 0x2c1   : > { %v1739_v45 = vmin.f32 %v1737_v39, 6.0  ;;  %v1725_v46 = vadd.f32 %v1723_v42, %v1720_v41 }
 0x2c2   : > { %2058 = vmatpush.bf16.msrb.mxu2 %v3015_v3  ;;  %v2006_v3 = vld [vmem:[%s4727_s13] sm:$0x1] }
 0x2c3   : > { %1743 = vst [vmem:[#allocation1] ss:$4 sm:$0xff] %v1739_v45  ;;  %v1730_v48 = vadd.f32 %v1728_v47, %v1725_v46  ;;  %2139 = vmatpush.bf16.msrb.mxu3 %v3024_v28  ;;  %v1975_v45 = vmul.f32 %v1973_v34, %v1968_v38  ;;  %v1977_v46 = vrot.slane %v1933_v7, 2  ;;  %v3022_v47 = vld [vmem:[#allocation29 + $0x18] sm:$0xff]  ;;  %v2189_v34 = vrot.slane %v2160_v21, 1 }
 0x2c4   : > { %v2199_v38 = vrot.slane %v2158_v11, 2 }
 0x2c5   : > { %v1736_v30 = vadd.f32 %v3272_v25, %v1730_v48 }
 0x2c6   : > { %2059 = vmatpush.bf16.msrb.mxu2 %v3014_v4 }
 0x2c7   : > { %v1738_v51 = vmax.f32 %v1736_v30, 0.0  ;;  %2140 = vmatpush.bf16.msrb.mxu3 %v3023_v35  ;;  %v1981_v30 = vrot.slane %v1934_v14, 2  ;;  %v2161_v14 = vld [vmem:[#allocation5] ss:$2 sm:$0x1] }
 0x2c8   : > { %v2177_v35 = vld [vmem:[#allocation5 + $0x9] ss:$2 sm:$0x1] }
 0x2c9   : > { %v1740_v52 = vmin.f32 %v1738_v51, 6.0 }
 0x2ca   : > { %2060 = vmatpush.bf16.msrb.mxu2 %v3013_v56 }
 0x2cb   : > { %1745 = vst [vmem:[#allocation1 + $0x1] ss:$4 sm:$0xff] %v1740_v52  ;;  %2141 = vmatpush.bf16.msrb.mxu3 %v3022_v47 }
 0x2ce   : > { %2061 = vmatpush.bf16.msrb.mxu2 %v3012_v5 }
 0x2d2   : > { %v1746_v53 = vld.sshfl [vmem:[#allocation1] sm:$0xff pattern:$0x73625140]  ;;  %2062 = vmatpush.bf16.msrb.mxu2 %v3011_v9  ;;  %v3028_v9 = vld [vmem:[#allocation32 + $0x8] sm:$0xff] }
 0x2d3   : > { %v1748_v54 = vpack.c.bf16 %v1746_v53, %v1746_v53  ;;  %v3021_v53 = vld [vmem:[#allocation29 + $0x10] sm:$0xff] }
 0x2d4   : > { %2142 = vmatpush.bf16.msrb.mxu3 %v3021_v53 }
 0x2d5   : > { %1825 = vmatmul.bf16.vlgmr.msra.gmra.mxu3 %v1748_v54 }
 0x358   : > { %v1826_v59 = vpop.f32.mrf.mxu3 }
 0x359   : > { %v1827_v40 = vadd.f32 %v3273_v57, %v1826_v59 }
 0x35b   : > { %v1830_v60 = vmax.f32 %v1827_v40, 0.0 }
 0x35d   : > { %v1831_v61 = vmin.f32 %v1830_v60, 6.0 }
 0x35f   : > { %v1833_v62 = vrot.slane %v1831_v61, 2  ;;  %1835 = vst [vmem:[%s4513_s6] sm:$0x3] %v1831_v61  ;;  %v1837_v44 = vpack.c.bf16 %v1831_v61, %v1831_v61 }
 0x360   : > { %v1828_v63 = vpop.f32.mrf.mxu3 }
 0x361   : > { %1836 = vst [vmem:[%s4513_s6 + $0x2] sm:$0x3] %v1833_v62  ;;  %1914 = vmatmul.bf16.vlgmr.msrb.gmra.mxu1 %v1837_v44  ;;  %v3020_v62 = vld [vmem:[#allocation29 + $0x8] sm:$0xff]  ;;  %v3019_v44 = vld [vmem:[#allocation29] sm:$0xff] }
 0x362   : > { %2143 = vmatpush.bf16.msrb.mxu3 %v3020_v62  ;;  %v3034_v63 = vld [vmem:[#allocation32 + $0x38] sm:$0xff] }
 0x363   : > { %2281 = vmatpush.bf16.msrb.mxu0 %v3034_v63 }
 0x366   : > { %2144 = vmatpush.bf16.msrb.mxu3 %v3019_v44 }
 0x367   : > { %2282 = vmatpush.bf16.msrb.mxu0 %v3033_v0 }
 0x36b   : > { %2283 = vmatpush.bf16.msrb.mxu0 %v3032_v50 }
 0x36f   : > { %2284 = vmatpush.bf16.msrb.mxu0 %v3031_v2 }
 0x373   : > { %2285 = vmatpush.bf16.msrb.mxu0 %v3030_v1 }
 0x377   : > { %2286 = vmatpush.bf16.msrb.mxu0 %v3029_v8 }
 0x37b   : > { %2287 = vmatpush.bf16.msrb.mxu0 %v3028_v9 }
 0x3de   : > { %v1915_v12 = vpop.f32.mrf.mxu1 }
 0x3df   : > { %v1916_v10 = vadd.f32 %v3274_v6, %v1915_v12  ;;  %v3027_v12 = vld [vmem:[#allocation32] sm:$0xff] }
 0x3e0   : > { %2288 = vmatpush.bf16.msrb.mxu0 %v3027_v12 }
 0x3e1   : > { %v1919_v16 = vmax.f32 %v1916_v10, 0.0  ;;  %v2088_v10 = vld [vmem:[%s4728_s27] sm:$0x1]  ;;  %s2342_s27 = sshll.u32 %s2339_s26, 4  ;;  %s2343_s27 = int_to_ptr.hbm [resolvable:$true] %s2342_s27 }
 0x3e2   : > { %s3799_s14 = sshra.s32 %s2343_s27, 4  ;;  %s3800_s14 = int_to_ptr.hbm [resolvable:$true] %s3799_s14 }
 0x3e3   : > { %v1920_v19 = vmin.f32 %v1919_v16, 6.0  ;;  %s3801_s25 = scalar_lea.hbm %s3800_s14, 4  ;;  %p3806_p12 = scmp.lt.s32.totalorder %s3800_s14, %s4730_s24 }
 0x3e4   : > { %p3802_p1 = scmp.ne.s32.totalorder %s3800_s14, %s3801_s25 }
 0x3e5   : > { %v1922_v25 = vrot.slane %v1920_v19, 2  ;;  %1930 = vst [vmem:[#allocation4 + $0x5] sm:$0x3] %v1920_v19  ;;  %v2166_v19 = vmul.f32 %v2161_v14, %v2158_v11 }
 0x3e6   : > { %v1917_v17 = vpop.f32.mrf.mxu1  ;;  %p3803_p3 = pnand %p3802_p1, %p4329_p4 }
 0x3e7   : > { %1931 = vst [vmem:[#allocation4 + $0x9] sm:$0x3] %v1922_v25  ;;  %v2169_v25 = vadd.f32 %v2168_v20, %v2166_v19  ;;  %v2170_v17 = vmul.f32 %v2165_v22, %v2160_v21 }
 0x3e8   : > { %p3804_p5 = pneg %p3803_p3 }
 0x3ec   : > { %v1949_v36 = vld [vmem:[#allocation4 + $0x5] ss:$2 sm:$0x1]  ;;  %v1970_v48 = vld [vmem:[#allocation4 + $0x6] ss:$2 sm:$0x1] }
 0x3ed   : > { %v1960_v39 = vmul.f32 %v1958_v31, %v1949_v36  ;;  %v1979_v52 = vmul.f32 %v1977_v46, %v1970_v48  ;;  %v2171_v31 = vadd.f32 %v2170_v17, %v2169_v25  ;;  %v2196_v46 = vld [vmem:[#allocation5 + $0x6] ss:$2 sm:$0x1] }
 0x3ee   : > { %v1951_v41 = vld [vmem:[#allocation4 + $0x9] ss:$2 sm:$0x1]  ;;  %v1972_v51 = vld [vmem:[#allocation4 + $0xa] ss:$2 sm:$0x1] }
 0x3ef   : > { %v1961_v42 = vadd.f32 %v1960_v39, %v1956_v32  ;;  %v1965_v43 = vmul.f32 %v1963_v33, %v1951_v41  ;;  %v1983_v37 = vmul.f32 %v1981_v30, %v1972_v51  ;;  %v2181_v32 = vmul.f32 %v2179_v26, %v2173_v27  ;;  %v2194_v41 = vld [vmem:[#allocation5 + $0x2] ss:$2 sm:$0x1]  ;;  %v2198_v30 = vld [vmem:[#allocation5 + $0xa] ss:$2 sm:$0x1] }
 0x3f0   : > { %v2184_v33 = vrot.slane %v2159_v13, 1  ;;  %v2201_v48 = vmul.f32 %v2199_v38, %v2194_v41 }
 0x3f1   : > { %v1966_v49 = vadd.f32 %v1965_v43, %v1961_v42  ;;  %v2182_v36 = vadd.f32 %v2181_v32, %v2171_v31  ;;  %v2191_v43 = vmul.f32 %v2189_v34, %v2177_v35 }
 0x3f3   : > { %v1976_v29 = vadd.f32 %v1975_v45, %v1966_v49  ;;  %v2203_v45 = vrot.slane %v2159_v13, 2  ;;  %v2207_v49 = vrot.slane %v2160_v21, 2 }
 0x3f5   : > { %v1980_v54 = vadd.f32 %v1979_v52, %v1976_v29  ;;  %v2205_v29 = vmul.f32 %v2203_v45, %v2196_v46  ;;  %v2209_v53 = vmul.f32 %v2207_v49, %v2198_v30 }
 0x3f7   : > { %v1984_v57 = vadd.f32 %v1983_v37, %v1980_v54  ;;  %v2211_v37 = vld [vmem:[%s4729_s17] sm:$0x1] }
 0x3f9   : > { %v1986_v59 = vadd.f32 %v1985_v55, %v1984_v57 }
 0x3fb   : > { %v1987_v40 = vmax.f32 %v1986_v59, 0.0 }
 0x3fd   : > { %v1988_v60 = vmin.f32 %v1987_v40, 6.0 }
 0x3ff   : > { %v1989_v61 = vpack.c.bf16 %v1988_v60, %v1988_v60 }
 0x401   : > { %2063 = vmatmul.bf16.vlgmr.msrb.gmra.mxu2 %v1989_v61 }
 0x484   : > { %v2064_v4 = vpop.f32.mrf.mxu2 }
 0x485   : > { %v2065_v56 = vadd.f32 %v2064_v4, %v2006_v3 }
 0x487   : > { %v2068_v5 = vmax.f32 %v2065_v56, 0.0 }
 0x489   : > { %v2069_v6 = vmin.f32 %v2068_v5, 6.0 }
 0x48b   : > { %2070 = vst [vmem:[%s4670_s4] sm:$0x1] %v2069_v6  ;;  %v2071_v58 = vpack.c.bf16 %v2069_v6, %v2069_v6  ;;  %s3805_s4 = scalar_lea.hbm %s4730_s24, 8 }
 0x48c   : > { %v2066_v7 = vpop.f32.mrf.mxu2  ;;  %p3807_p7 = scmp.lt.s32.totalorder %s3805_s4, %s3801_s25 }
 0x48d   : > { %2145 = vmatmul.bf16.vlgmr.msrb.gmra.mxu3 %v2071_v58 }
 0x48e   : > { %p3808_p8 = por %p3807_p7, %p3806_p12 }
 0x490   : > { %p3809_p9 = pnand %p3808_p8, %p3804_p5 }
 0x510   : > { %v2146_v16 = vpop.f32.mrf.mxu3 }
 0x511   : > { %v2147_v18 = vadd.f32 %v2146_v16, %v2088_v10 }
 0x513   : > { %v2150_v23 = vmax.f32 %v2147_v18, 0.0 }
 0x515   : > { %v2151_v24 = vmin.f32 %v2150_v23, 6.0 }
 0x517   : > { %2157 = vst [vmem:[#allocation5 + $0x5] sm:$0x1] %v2151_v24 }
 0x518   : > { %v2148_v28 = vpop.f32.mrf.mxu3 }
 0x51e   : > { %v2175_v39 = vld [vmem:[#allocation5 + $0x5] ss:$2 sm:$0x1] }
 0x51f   : > { %v2186_v42 = vmul.f32 %v2184_v33, %v2175_v39 }
 0x521   : > { %v2187_v47 = vadd.f32 %v2186_v42, %v2182_v36 }
 0x523   : > { %v2192_v51 = vadd.f32 %v2191_v43, %v2187_v47 }
 0x525   : > { %v2202_v52 = vadd.f32 %v2201_v48, %v2192_v51 }
 0x527   : > { %v2206_v54 = vadd.f32 %v2205_v29, %v2202_v52 }
 0x529   : > { %v2210_v55 = vadd.f32 %v2209_v53, %v2206_v54 }
 0x52b   : > { %v2212_v57 = vadd.f32 %v2211_v37, %v2210_v55 }
 0x52d   : > { %v2213_v59 = vmax.f32 %v2212_v57, 0.0 }
 0x52f   : > { %v2214_v40 = vmin.f32 %v2213_v59, 6.0 }
 0x531   : > { %v2215_v60 = vpack.c.bf16 %v2214_v40, %v2214_v40 }
 0x533   : > { %2289 = vmatmul.bf16.vlgmr.msrb.gmra.mxu0 %v2215_v60 }
 0x534   : > { %3812 = shalt.err (!%p3809_p9)
}
 0x535   : > { %s3998_s22 = smov 32   ;;  %s3999_s12 = smov 2  }
 0x536   : > { %3104 = dma.vmem_to_hbm [thread:$0]  (%p4329_p4), %s2341_s1, 64, %s2343_s27, %s4550_s0, %s3998_s22, %s3998_s22, %s3999_s12  }
 0x537   : > { %s3035_s10 = sshll.u32 %s4171_s11, 4  ;;  %s4731_s6 = sld [smem:[#allocation75_spill]] }
 0x538   : > { %s4732_s25 = sld [smem:[#allocation77_spill]]  ;;  %s2298_s18 = scalar_lea.sflag [#allocation8], %s4360_s7 }
 0x53d   : > { %s2322_s15 = scalar_lea.hbm %s4731_s6, %s3035_s10  ;;  %s3833_s22 = scalar_lea.hbm %s4731_s6, 32 }
 0x53e   : > { %s2325_s16 = sshll.u32 %s2322_s15, 4  ;;  %s2354_s17 = scalar_lea.hbm %s4732_s25, %s4171_s11  ;;  %s2326_s16 = int_to_ptr.hbm [resolvable:$true] %s2325_s16 }
 0x53f   : > { %s3827_s19 = sshra.s32 %s2326_s16, 4  ;;  %s3828_s19 = int_to_ptr.hbm [resolvable:$true] %s3827_s19 }
 0x540   : > { %s3829_s21 = scalar_lea.hbm %s3828_s19, 16  ;;  %p3834_p0 = scmp.lt.s32.totalorder %s3828_s19, %s4731_s6 }
 0x541   : > { %p3830_p10 = scmp.ne.s32.totalorder %s3828_s19, %s3829_s21  ;;  %p3835_p2 = scmp.lt.s32.totalorder %s3833_s22, %s3829_s21 }
 0x543   : > { %p3831_p13 = pnand %p3830_p10, %p4329_p4  ;;  %p3836_p1 = por %p3835_p2, %p3834_p0 }
 0x545   : > { %p3832_p11 = pneg %p3831_p13 }
 0x547   : > { %p3837_p3 = pnand %p3836_p1, %p3832_p11 }
 0x549   : > { %3840 = shalt.err (!%p3837_p3)
}
 0x54a   : > { %s4000_s13 = smov 64   ;;  %s4001_s26 = smov 4  }
 0x54b   : > { %3103 = dma.vmem_to_hbm [thread:$0]  (%p4329_p4), %s4543_s29, 256, %s2326_s16, %s2298_s18, %s4000_s13, %s4000_s13, %s4001_s26  }
 0x54c   : > { %s4733_s15 = scalar_lea.vmem [#allocation36], %s4360_s7  ;;  %s2358_s14 = sshll.u32 %s2354_s17, 4  ;;  %s2359_s14 = int_to_ptr.hbm [resolvable:$true] %s2358_s14 }
 0x54d   : > { %s2356_s4 = sshll.u32 %s4733_s15, 4  ;;  %s3855_s1 = sshra.s32 %s2359_s14, 4  ;;  %s2357_s4 = int_to_ptr.vmem [resolvable:$true] %s2356_s4  ;;  %s3856_s1 = int_to_ptr.hbm [resolvable:$true] %s3855_s1 }
 0x54e   : > { %s3857_s19 = scalar_lea.hbm %s3856_s1, 1  ;;  %s3861_s22 = scalar_lea.hbm %s4732_s25, 2 }
 0x54f   : > { %p3858_p5 = scmp.ne.s32.totalorder %s3856_s1, %s3857_s19  ;;  %p3862_p8 = scmp.lt.s32.totalorder %s3856_s1, %s4732_s25 }
 0x550   : > { %p3863_p9 = scmp.lt.s32.totalorder %s3861_s22, %s3857_s19 }
 0x551   : > { %p3859_p12 = pnand %p3858_p5, %p4329_p4 }
 0x552   : > { %p3864_p10 = por %p3863_p9, %p3862_p8 }
 0x553   : > { %p3860_p7 = pneg %p3859_p12 }
 0x555   : > { %p3865_p13 = pnand %p3864_p10, %p3860_p7 }
 0x557   : > { %3868 = shalt.err (!%p3865_p13)
}
 0x558   : > { %3105 = dma.vmem_to_hbm [thread:$0]  (%p4329_p4), %s2357_s4, 16, %s2359_s14, %s4550_s0  }
 0x559   : > { %s4734_s16 = sld [smem:[#allocation74_spill]]  ;;  %s1145_s1 = scalar_lea.vmem [#allocation37], %s4360_s7 }
 0x55a   : > { %s4735_s26 = sld [smem:[#allocation78_spill]]  ;;  %s2369_s19 = sshll.u32 %s1145_s1, 4  ;;  %s2370_s19 = int_to_ptr.vmem [resolvable:$true] %s2369_s19 }
 0x55b   : > { %s2312_s0 = scalar_lea.sflag [#allocation38], %s4360_s7 }
 0x55f   : > { %v2232_v61 = vld [vmem:[%s4734_s16] sm:$0x1] }
 0x560   : > { %s2367_s15 = scalar_lea.hbm %s4735_s26, %s4171_s11  ;;  %s3889_s22 = scalar_lea.hbm %s4735_s26, 2 }
 0x561   : > { %s2371_s21 = sshll.u32 %s2367_s15, 4  ;;  %s2372_s21 = int_to_ptr.hbm [resolvable:$true] %s2371_s21 }
 0x562   : > { %s3883_s4 = sshra.s32 %s2372_s21, 4  ;;  %s3884_s4 = int_to_ptr.hbm [resolvable:$true] %s3883_s4 }
 0x563   : > { %s3885_s14 = scalar_lea.hbm %s3884_s4, 1  ;;  %p3890_p1 = scmp.lt.s32.totalorder %s3884_s4, %s4735_s26 }
 0x564   : > { %p3886_p11 = scmp.ne.s32.totalorder %s3884_s4, %s3885_s14  ;;  %p3891_p3 = scmp.lt.s32.totalorder %s3889_s22, %s3885_s14 }
 0x566   : > { %p3887_p0 = pnand %p3886_p11, %p4329_p4  ;;  %p3892_p5 = por %p3891_p3, %p3890_p1 }
 0x568   : > { %p3888_p2 = pneg %p3887_p0 }
 0x56a   : > { %p3893_p12 = pnand %p3892_p5, %p3888_p2 }
 0x5b0   : > { %v2290_v62 = vpop.f32.mrf.mxu0 }
 0x5b1   : > { %v2291_v44 = vadd.f32 %v2290_v62, %v2232_v61 }
 0x5b3   : > { %v2294_v63 = vmax.f32 %v2291_v44, 0.0 }
 0x5b5   : > { %v2295_v0 = vmin.f32 %v2294_v63, 6.0 }
 0x5b7   : > { %2296 = vst [vmem:[%s1145_s1] sm:$0x1] %v2295_v0 }
 0x5b8   : > { %v2292_v50 = vpop.f32.mrf.mxu0 }
 0x5b9   : > { %3896 = shalt.err (!%p3893_p12)
}
 0x5ba   : > { %3106 = dma.vmem_to_hbm [thread:$0]  (%p4329_p4), %s2370_s19, 16, %s2372_s21, %s2312_s0  }
 0x5bb PF: > { %s2383_s7 = sand.u32 1, %s3963_s8   ;;  %p4736_p7 = scmp.ge.s32.totalorder %s3975_s30, 2 }
 0x5bc   : > { %s2384_s18 = scalar_lea.sflag [#allocation8], %s2383_s7 }
 0x5bd   : > { %p3165_p8 = pnand %p4736_p7, %p4333_p6 }
 0x5bf   : > { %p3166_p9 = pneg %p3165_p8 }
 0x5c1   : > { %3950 = dma.done.wait (%p3166_p9), %s2384_s18, 256  }
 0x5c2   : > { %3952 = vsyncadd (%p3166_p9), %s2384_s18, 4294967040  ;;  %s4737_s29 = sadd.s32 4294967294, %s3975_s30  }
 0x5c3   : > { %s2393_s16 = sand.u32 1, %s4737_s29  }
 0x5c4   : > { %s2394_s17 = scalar_lea.sflag [#allocation35], %s2393_s16 }
 0x5c5   : > { %3954 = dma.done.wait (%p3166_p9), %s2394_s17, 80  }
 0x5c6   : > { %3956 = vsyncadd (%p3166_p9), %s2394_s17, 4294967216  ;;  %s2413_s3 = scalar_lea.sflag [#allocation38], %s2383_s7 }
 0x5c7   : > { %3958 = dma.done.wait (%p3166_p9), %s2413_s3, 16  }
 0x5c8   : > { %3960 = vsyncadd (%p3166_p9), %s2413_s3, 4294967280  ;;  %p56_p4 = scmp.ge.s32.totalorder %s4301_s20, 4   ;;  %s4738_s8 = smov %s3967_s5 }
 0x5c9   : > { %s4739_s5 = smov %s3971_s9  ;;  %s4740_s9 = smov %s4312_s2 }
 0x5ca   : > { %s4741_s30 = smov %s4301_s20  ;;  %58 = sbr.rel (!%p56_p4) target bundleno = 46 (0x2e), region = 342 }
 0x5cf   :  { %2418 = vsyncpa [#allocation7], 1 }
 0x5d0   :  { %2420 = vsyncpa [#allocation7 + $0x1], 1 }
 0x5d1   :  { %2421 = vsyncpa [#allocation10], 1 }
 0x5d2   :  { %2422 = vsyncpa [#allocation13], 1 }
 0x5d3   :  { %2423 = vsyncpa [#allocation16], 1 }
 0x5d4   :  { %2424 = vsyncpa [#allocation19], 1 }
 0x5d5   :  { %2425 = vsyncpa [#allocation22], 1 }
 0x5d6   :  { %2426 = vsyncpa [#allocation25], 1 }
 0x5d7   :  { %2427 = vsyncpa [#allocation28], 1 }
 0x5d8   :  { %2428 = vsyncpa [#allocation31], 1 }
 0x5d9   :  { %2429 = vsyncpa [#allocation8], 1 }
 0x5da   :  { %2431 = vsyncpa [#allocation8 + $0x1], 1 }
 0x5db   :  { %2432 = vsyncpa [#allocation35], 1 }
 0x5dc   :  { %2434 = vsyncpa [#allocation35 + $0x1], 1 }
 0x5dd   :  { %2435 = vsyncpa [#allocation38], 1 }
 0x5de   :  { %2437 = vsyncpa [#allocation38 + $0x1], 1 }

</bundles_post_ra>
